<compile_context>
chip_gen: v6e
topology: v6e:2x2x1
jax: 0.10.0
libtpu: 0.0.40
codegen_flags: <defaults>
</compile_context>

<pallas_src>
import functools

import jax
import jax.numpy as jnp
from jax.experimental import pallas as pl
from jax.experimental.pallas import tpu as pltpu

_LANES = 128
_NB = 8            # batch rows per output block (sublane-dense stores)


def _round_up(x, m):
    return ((x + m - 1) // m) * m


def _pad_axis(x, axis, new_size):
    pad = [(0, 0)] * x.ndim
    pad[axis] = (0, new_size - x.shape[axis])
    return jnp.pad(x, pad)


def _pick_tile(S, cap=128):
    """Largest row tile <= cap that divides S and is a multiple of 8 (or full S)."""
    if S <= cap:
        return int(S)
    t = cap - (cap % 8)
    while t >= 8:
        if S % t == 0:
            return int(t)
        t -= 8
    return int(S)


# ----------------------------------------------------------------------------
# Fused kernel: (rows @ W1 + b1) -> [relu] -> per-sample sum -> @ W2 + b2
# Grid = (batch_tiles [parallel], row_tiles [arbitrary reduction]).
# Members of one kind are concatenated along the output-channel dims of W1/W2
# (W2 is block-diagonal), so one matmul serves the whole ensemble of that kind.
# ----------------------------------------------------------------------------

def _fused_member_concat_kernel(x_ref, w1_ref, b1_ref, w2_ref, b2_ref,
                                o_ref, acc_ref, *, relu):
    s = pl.program_id(1)

    @pl.when(s == 0)
    def _():
        acc_ref[...] = jnp.zeros_like(acc_ref)

    NB, T, Kp = x_ref.shape
    x = x_ref[...].reshape(NB * T, Kp)                       # bf16, lane-dense K
    h = jnp.dot(x, w1_ref[...], preferred_element_type=jnp.float32)
    h = h + b1_ref[...].astype(jnp.float32)                  # (NB*T, HID_ALL) f32
    if relu:
        h = jnp.maximum(h, 0.0)
    # Local value accumulation; a single VMEM read-modify-write per step.
    acc_ref[...] += h.reshape(NB, T, h.shape[-1]).sum(axis=1)

    @pl.when(s == pl.num_programs(1) - 1)
    def _():
        pooled = acc_ref[...]                                # (NB, HID_ALL) f32
        logits = jnp.dot(pooled.astype(w2_ref.dtype), w2_ref[...],
                         preferred_element_type=jnp.float32)
        logits = logits + b2_ref[...].astype(jnp.float32)
        o_ref[...] = logits.astype(o_ref.dtype)              # dense (8, OUT) store


def _run_fused(x, w1, b1, w2, b2, *, relu, row_tile):
    """x: (Np, S, Kp) bf16, Np % 8 == 0, S % row_tile == 0, Kp % 128 == 0."""
    Np, S, Kp = x.shape
    HID = w1.shape[1]
    OUT = w2.shape[1]
    # Fold the mean-pool 1/S scale into the head weights: the kernel only sums.
    w2 = (w2.astype(jnp.float32) * (1.0 / S)).astype(w2.dtype)
    grid = (Np // _NB, S // row_tile)
    kernel = functools.partial(_fused_member_concat_kernel, relu=relu)
    return pl.pallas_call(
        kernel,
        out_shape=jax.ShapeDtypeStruct((Np, OUT), jnp.float32),
        grid=grid,
        in_specs=[
            pl.BlockSpec((_NB, row_tile, Kp), lambda b, s: (b, s, 0)),
            # Weight/bias blocks are grid-invariant (constant index_map); the
            # pipeline fetches them once and does not re-copy per step.
            pl.BlockSpec((Kp, HID), lambda b, s: (0, 0)),
            pl.BlockSpec((1, HID), lambda b, s: (0, 0)),
            pl.BlockSpec((HID, OUT), lambda b, s: (0, 0)),
            pl.BlockSpec((1, OUT), lambda b, s: (0, 0)),
        ],
        out_specs=pl.BlockSpec((_NB, OUT), lambda b, s: (b, 0)),
        scratch_shapes=[pltpu.VMEM((_NB, HID), jnp.float32)],
        compiler_params=pltpu.CompilerParams(
            dimension_semantics=("parallel", "arbitrary"),
            vmem_limit_bytes=32 * 1024 * 1024),
    )(x, w1, b1, w2, b2)


@functools.partial(jax.jit, static_argnames=("row_tile",))
def _resnet_stack_forward(images, w1, b1, w2, b2, *, row_tile):
    """images (N,C,H,W) -> (N, M_rn*OUTP) f32 logits for all ResNet-like members."""
    N, C, H, W = images.shape
    # SAME halo pad + im2col in the wrapper: one K=9*C contraction in the kernel.
    xp = jnp.pad(images.astype(jnp.float32).transpose(0, 2, 3, 1),
                 ((0, 0), (1, 1), (1, 1), (0, 0)))
    cols = [xp[:, dh:dh + H, dw:dw + W, :] for dh in range(3) for dw in range(3)]
    x = jnp.concatenate(cols, axis=-1).reshape(N, H * W, 9 * C)
    Kp = w1.shape[0]
    x = _pad_axis(x, 2, Kp).astype(jnp.bfloat16)          # lane-dense K, bf16 MXU
    Np = _round_up(N, _NB)
    x = _pad_axis(x, 0, Np)                               # sublane-dense batch rows
    out = _run_fused(x, w1, b1, w2, b2, relu=True, row_tile=row_tile)
    return out[:N]


@functools.partial(jax.jit, static_argnames=("patch", "row_tile"))
def _vit_stack_forward(images, w1, b1, w2, b2, *, patch, row_tile):
    """images (N,C,H,W) -> (N, M_vit*OUTP) f32 logits for all ViT-like members."""
    N, C, H, W = images.shape
    Hp, Wp = H // patch, W // patch
    x = images.astype(jnp.float32).reshape(N, C, Hp, patch, Wp, patch)
    x = x.transpose(0, 2, 4, 1, 3, 5).reshape(N, Hp * Wp, C * patch * patch)
    Kp = w1.shape[0]
    x = _pad_axis(x, 2, Kp).astype(jnp.bfloat16)          # autocast mimic, dense K
    Np = _round_up(N, _NB)
    x = _pad_axis(x, 0, Np)
    out = _run_fused(x, w1, b1, w2, b2, relu=False, row_tile=row_tile)
    return out[:N]


# ----------------------------------------------------------------------------
# Member networks (synthetic, deterministic parameters)
# ----------------------------------------------------------------------------

def make_resnet_like_params(key, in_ch, hidden, num_classes):
    k1, k2, k3, k4 = jax.random.split(key, 4)
    return dict(
        w_conv=jax.random.normal(k1, (hidden, in_ch, 3, 3), jnp.float32) * 0.1,
        b_conv=jax.random.normal(k2, (hidden,), jnp.float32) * 0.01,
        w_fc=jax.random.normal(k3, (hidden, num_classes), jnp.float32) * 0.1,
        b_fc=jax.random.normal(k4, (num_classes,), jnp.float32) * 0.01,
    )


def make_vit_like_params(key, in_ch, patch, embed, num_classes):
    k1, k2, k3, k4 = jax.random.split(key, 4)
    return dict(
        w_patch=jax.random.normal(k1, (in_ch * patch * patch, embed), jnp.float32) * 0.05,
        b_patch=jax.random.normal(k2, (embed,), jnp.float32) * 0.01,
        w_head=jax.random.normal(k3, (embed, num_classes), jnp.float32) * 0.05,
        b_head=jax.random.normal(k4, (num_classes,), jnp.float32) * 0.01,
    )


# ----------------------------------------------------------------------------
# Nets ensemble wrapper (mirrors the PyTorch Nets.forward)
# ----------------------------------------------------------------------------

class NetsPallas:
    def __init__(self, keys, indices, *, in_ch=3, hidden=32, patch=4,
                 embed=32, num_classes=16, seed=0):
        self.indices = None if indices is None else jnp.asarray(indices)
        self.patch = patch
        self.key_order = list(keys)
        self.kind = {k: ('vit' if k[:3] == 'VIT' else 'resnet') for k in keys}
        self.n_out = num_classes if self.indices is None else int(self.indices.shape[0])

        HIDP = _round_up(hidden, _LANES)
        EMBP = _round_up(embed, _LANES)
        OUTP = _round_up(self.n_out, _LANES)
        self.OUTP = OUTP

        self._rn_keys = [k for k in self.key_order if self.kind[k] == 'resnet']
        self._vit_keys = [k for k in self.key_order if self.kind[k] == 'vit']

        root = jax.random.PRNGKey(seed)
        self.params = {}
        for i, key in enumerate(self.key_order):
            sub = jax.random.fold_in(root, i)
            if self.kind[key] == 'vit':
                self.params[key] = make_vit_like_params(sub, in_ch, patch, embed,
                                                        num_classes)
            else:
                self.params[key] = make_resnet_like_params(sub, in_ch, hidden,
                                                           num_classes)

        def head_cols(w, b):
            if self.indices is None:
                return w, b
            return w[:, self.indices], b[self.indices]

        # ResNet members: concatenate along the output-channel dim; W2 block-diag.
        self._rn_params = None
        if self._rn_keys:
            Kc = 9 * in_ch
            Kp = _round_up(Kc, _LANES)
            M = len(self._rn_keys)
            w1 = jnp.zeros((Kp, M * HIDP), jnp.float32)
            b1 = jnp.zeros((1, M * HIDP), jnp.float32)
            w2 = jnp.zeros((M * HIDP, M * OUTP), jnp.float32)
            b2 = jnp.zeros((1, M * OUTP), jnp.float32)
            for m, key in enumerate(self._rn_keys):
                p = self.params[key]
                # (hid,c,kh,kw) -> (kh,kw,c,hid) -> (9*C, hid); matches im2col order.
                taps = p['w_conv'].transpose(2, 3, 1, 0).reshape(Kc, hidden)
                w1 = w1.at[:Kc, m * HIDP:m * HIDP + hidden].set(taps)
                b1 = b1.at[0, m * HIDP:m * HIDP + hidden].set(p['b_conv'])
                wf, bf = head_cols(p['w_fc'], p['b_fc'])
                w2 = w2.at[m * HIDP:m * HIDP + hidden,
                           m * OUTP:m * OUTP + self.n_out].set(wf)
                b2 = b2.at[0, m * OUTP:m * OUTP + self.n_out].set(bf)
            self._rn_params = (w1.astype(jnp.bfloat16), b1, w2, b2)

        # ViT members: same concatenation; bf16 patch-embed + bf16 head (autocast).
        self._vit_params = None
        if self._vit_keys:
            Kc = in_ch * patch * patch
            Kp = _round_up(Kc, _LANES)
            M = len(self._vit_keys)
            w1 = jnp.zeros((Kp, M * EMBP), jnp.float32)
            b1 = jnp.zeros((1, M * EMBP), jnp.float32)
            w2 = jnp.zeros((M * EMBP, M * OUTP), jnp.float32)
            b2 = jnp.zeros((1, M * OUTP), jnp.float32)
            for m, key in enumerate(self._vit_keys):
                p = self.params[key]
                w1 = w1.at[:Kc, m * EMBP:m * EMBP + embed].set(p['w_patch'])
                b1 = b1.at[0, m * EMBP:m * EMBP + embed].set(p['b_patch'])
                wh, bh = head_cols(p['w_head'], p['b_head'])
                w2 = w2.at[m * EMBP:m * EMBP + embed,
                           m * OUTP:m * OUTP + self.n_out].set(wh)
                b2 = b2.at[0, m * OUTP:m * OUTP + self.n_out].set(bh)
            self._vit_params = (w1.astype(jnp.bfloat16), b1,
                                w2.astype(jnp.bfloat16), b2)

    def __call__(self, images):
        N, C, H, W = images.shape
        rn_out = vit_out = None
        if self._rn_keys:                                   # one call, all members
            rn_out = _resnet_stack_forward(images, *self._rn_params,
                                           row_tile=_pick_tile(H * W))
        if self._vit_keys:                                  # one call, all members
            T = (H // self.patch) * (W // self.patch)
            vit_out = _vit_stack_forward(images, *self._vit_params,
                                         patch=self.patch, row_tile=_pick_tile(T))

        rn_pos = {k: m for m, k in enumerate(self._rn_keys)}
        vit_pos = {k: m for m, k in enumerate(self._vit_keys)}
        out = {}
        for key in self.key_order:                          # preserve dict order
            if self.kind[key] == 'vit':
                m = vit_pos[key]
                out[key] = vit_out[:, m * self.OUTP:m * self.OUTP + self.n_out]
            else:
                m = rn_pos[key]
                out[key] = rn_out[:, m * self.OUTP:m * self.OUTP + self.n_out]
        return out


# ----------------------------------------------------------------------------
# Pure-JAX reference (f32) for a correctness cross-check
# ----------------------------------------------------------------------------

def _ref_forward(images, nets):
    N, C, H, W = images.shape
    out = {}
    for key in nets.key_order:
        p = nets.params[key]
        if nets.kind[key] == 'resnet':
            xp = jnp.pad(images.transpose(0, 2, 3, 1),
                         ((0, 0), (1, 1), (1, 1), (0, 0)))
            cols = jnp.concatenate(
                [xp[:, dh:dh + H, dw:dw + W, :] for dh in range(3) for dw in range(3)],
                axis=-1).reshape(N, H * W, 9 * C)
            taps = p['w_conv'].transpose(2, 3, 1, 0).reshape(9 * C, -1)
            conv = jnp.maximum(cols @ taps + p['b_conv'], 0.0)
            logits = conv.mean(axis=1) @ p['w_fc'] + p['b_fc']
        else:
            patch = nets.patch
            Hp, Wp = H // patch, W // patch
            x = images.reshape(N, C, Hp, patch, Wp, patch)
            x = x.transpose(0, 2, 4, 1, 3, 5).reshape(N, Hp * Wp, -1)
            tok = x @ p['w_patch'] + p['b_patch']
            logits = tok.mean(axis=1) @ p['w_head'] + p['b_head']
        if nets.indices is not None:
            logits = logits[:, nets.indices]
        out[key] = logits
    return out


# ----------------------------------------------------------------------------

if __name__ == "__main__":
    key = jax.random.PRNGKey(0)
    N, C, H, W = 2, 3, 16, 16
    num_classes = 16

    images = jax.random.normal(key, (N, C, H, W), jnp.float32)
    indices = jnp.array([0, 2, 4, 6, 8, 10, 12, 14], dtype=jnp.int32)

    nets = NetsPallas(keys=['RN50', 'VIT_deit'], indices=indices,
                      num_classes=num_classes, seed=0)
    out = nets(images)
    ref = _ref_forward(images, nets)

    for k, v in out.items():
        v = jax.block_until_ready(v)
        assert v.shape == (N, int(indices.shape[0])), (k, v.shape)
        assert v.dtype == jnp.float32, (k, v.dtype)
        assert bool(jnp.all(jnp.isfinite(v))), k
        err = float(jnp.max(jnp.abs(v - ref[k])))
        assert err < 5e-2, (k, err)   # bf16 MXU vs f32 reference tolerance

    print("KERNEL_OK")
</pallas_src>

<mosaic_0001>
module attributes {stable_mosaic.version = 11 : i64} {
  func.func @_fused_member_concat_kernel(%arg0: i32, %arg1: i32, %arg2: memref<8x128x128xbf16, #tpu.memory_space<vmem>>, %arg3: memref<128x128xbf16, #tpu.memory_space<vmem>>, %arg4: memref<1x128xf32, #tpu.memory_space<vmem>>, %arg5: memref<128x128xf32, #tpu.memory_space<vmem>>, %arg6: memref<1x128xf32, #tpu.memory_space<vmem>>, %arg7: memref<8x128xf32, #tpu.memory_space<vmem>>, %arg8: memref<8x128xf32, #tpu.memory_space<vmem>>) attributes {dimension_semantics = [#tpu.dimension_semantics<parallel>, #tpu.dimension_semantics<arbitrary>], iteration_bounds = array<i64: 1, 2>, scalar_prefetch = 0 : i64, scratch_operands = 1 : i64, tpu.core_type = #tpu.core_type<tc>, window_params = [{transform_indices = @transform_0, window_bounds = array<i64: 8, 128, 128>}, {pipeline_mode = #tpu.pipeline_mode<synchronous>, transform_indices = @transform_1, window_bounds = array<i64: 128, 128>}, {pipeline_mode = #tpu.pipeline_mode<synchronous>, transform_indices = @transform_2, window_bounds = array<i64: 1, 128>}, {pipeline_mode = #tpu.pipeline_mode<synchronous>, transform_indices = @transform_3, window_bounds = array<i64: 128, 128>}, {pipeline_mode = #tpu.pipeline_mode<synchronous>, transform_indices = @transform_4, window_bounds = array<i64: 1, 128>}, {transform_indices = @transform_5, window_bounds = array<i64: 8, 128>}]} {
    %c0_i32 = arith.constant 0 : i32
    %0 = arith.cmpi eq, %arg1, %c0_i32 : i32
    %1 = arith.extui %0 : i1 to i32
    %c0_i32_0 = arith.constant 0 : i32
    %2 = arith.cmpi ne, %1, %c0_i32_0 : i32
    scf.if %2 {
      %cst_14 = arith.constant 0.000000e+00 : f32
      %20 = vector.broadcast %cst_14 : f32 to vector<8x128xf32>
      %c0_15 = arith.constant 0 : index
      %c0_16 = arith.constant 0 : index
      %21 = vector.load %arg8[%c0_15, %c0_16] : memref<8x128xf32, #tpu.memory_space<vmem>>, vector<8x128xf32>
      tpu.vector_store %arg8[%c0_15, %c0_16], %20 {strides = array<i32>} : memref<8x128xf32, #tpu.memory_space<vmem>>, vector<8x128xf32>,
    } else {
    }
    %c0 = arith.constant 0 : index
    %c0_1 = arith.constant 0 : index
    %c0_2 = arith.constant 0 : index
    %3 = vector.load %arg2[%c0, %c0_1, %c0_2] : memref<8x128x128xbf16, #tpu.memory_space<vmem>>, vector<8x128x128xbf16>
    %4 = vector.shape_cast %3 : vector<8x128x128xbf16> to vector<1024x128xbf16>
    %c0_3 = arith.constant 0 : index
    %c0_4 = arith.constant 0 : index
    %5 = vector.load %arg3[%c0_3, %c0_4] : memref<128x128xbf16, #tpu.memory_space<vmem>>, vector<128x128xbf16>
    %cst = arith.constant dense<0.000000e+00> : vector<1024x128xf32>
    %6 = tpu.matmul %4, %5, %cst {dimension_numbers = #tpu.dot_dimension_numbers<[1], [0], [0], [1], [0, 0, 1, 1], [], []>} : vector<1024x128xbf16>, vector<128x128xbf16>, vector<1024x128xf32> -> vector<1024x128xf32>
    %c0_5 = arith.constant 0 : index
    %c0_6 = arith.constant 0 : index
    %7 = vector.load %arg4[%c0_5, %c0_6] : memref<1x128xf32, #tpu.memory_space<vmem>>, vector<1x128xf32>
    %8 = vector.broadcast %7 : vector<1x128xf32> to vector<1024x128xf32>
    %9 = arith.addf %6, %8 : vector<1024x128xf32>
    %cst_7 = arith.constant 0.000000e+00 : f32
    %10 = vector.broadcast %cst_7 : f32 to vector<1024x128xf32>
    %11 = arith.maximumf %9, %10 : vector<1024x128xf32>
    %c0_8 = arith.constant 0 : index
    %c0_9 = arith.constant 0 : index
    %12 = vector.load %arg8[%c0_8, %c0_9] : memref<8x128xf32, #tpu.memory_space<vmem>>, vector<8x128xf32>
    %13 = vector.shape_cast %11 : vector<1024x128xf32> to vector<8x128x128xf32>
    %cst_10 = arith.constant dense<0.000000e+00> : vector<8x128xf32>
    %14 = vector.multi_reduction <add>, %13, %cst_10 [1] : vector<8x128x128xf32> to vector<8x128xf32>
    %15 = arith.addf %12, %14 : vector<8x128xf32>
    %c0_11 = arith.constant 0 : index
    %c0_12 = arith.constant 0 : index
    %16 = vector.load %arg8[%c0_11, %c0_12] : memref<8x128xf32, #tpu.memory_space<vmem>>, vector<8x128xf32>
    tpu.vector_store %arg8[%c0_11, %c0_12], %15 {strides = array<i32>} : memref<8x128xf32, #tpu.memory_space<vmem>>, vector<8x128xf32>,
    %c1_i32 = arith.constant 1 : i32
    %17 = arith.cmpi eq, %arg1, %c1_i32 : i32
    %18 = arith.extui %17 : i1 to i32
    %c0_i32_13 = arith.constant 0 : i32
    %19 = arith.cmpi ne, %18, %c0_i32_13 : i32
    scf.if %19 {
      %c0_14 = arith.constant 0 : index
      %c0_15 = arith.constant 0 : index
      %20 = vector.load %arg8[%c0_14, %c0_15] : memref<8x128xf32, #tpu.memory_space<vmem>>, vector<8x128xf32>
      %c0_16 = arith.constant 0 : index
      %c0_17 = arith.constant 0 : index
      %21 = vector.load %arg5[%c0_16, %c0_17] : memref<128x128xf32, #tpu.memory_space<vmem>>, vector<128x128xf32>
      %cst_18 = arith.constant dense<0.000000e+00> : vector<8x128xf32>
      %22 = tpu.matmul %20, %21, %cst_18 {dimension_numbers = #tpu.dot_dimension_numbers<[1], [0], [0], [1], [0, 0, 1, 1], [], []>} : vector<8x128xf32>, vector<128x128xf32>, vector<8x128xf32> -> vector<8x128xf32>
      %c0_19 = arith.constant 0 : index
      %c0_20 = arith.constant 0 : index
      %23 = vector.load %arg6[%c0_19, %c0_20] : memref<1x128xf32, #tpu.memory_space<vmem>>, vector<1x128xf32>
      %24 = vector.broadcast %23 : vector<1x128xf32> to vector<8x128xf32>
      %25 = arith.addf %22, %24 : vector<8x128xf32>
      %c0_21 = arith.constant 0 : index
      %c0_22 = arith.constant 0 : index
      %26 = vector.load %arg7[%c0_21, %c0_22] : memref<8x128xf32, #tpu.memory_space<vmem>>, vector<8x128xf32>
      tpu.vector_store %arg7[%c0_21, %c0_22], %25 {strides = array<i32>} : memref<8x128xf32, #tpu.memory_space<vmem>>, vector<8x128xf32>,
    } else {
    }
    return
  }
  func.func @transform_0(%arg0: i32, %arg1: i32) -> (i32, i32, i32) {
    %c0_i32 = arith.constant 0 : i32
    %c0_i32_0 = arith.constant 0 : i32
    return %arg0, %arg1, %c0_i32 : i32, i32, i32
  }
  func.func @transform_1(%arg0: i32, %arg1: i32) -> (i32, i32) {
    %c0_i32 = arith.constant 0 : i32
    %c0_i32_0 = arith.constant 0 : i32
    %c0_i32_1 = arith.constant 0 : i32
    return %c0_i32, %c0_i32_0 : i32, i32
  }
  func.func @transform_2(%arg0: i32, %arg1: i32) -> (i32, i32) {
    %c0_i32 = arith.constant 0 : i32
    %c0_i32_0 = arith.constant 0 : i32
    %c0_i32_1 = arith.constant 0 : i32
    return %c0_i32, %c0_i32_0 : i32, i32
  }
  func.func @transform_3(%arg0: i32, %arg1: i32) -> (i32, i32) {
    %c0_i32 = arith.constant 0 : i32
    %c0_i32_0 = arith.constant 0 : i32
    %c0_i32_1 = arith.constant 0 : i32
    return %c0_i32, %c0_i32_0 : i32, i32
  }
  func.func @transform_4(%arg0: i32, %arg1: i32) -> (i32, i32) {
    %c0_i32 = arith.constant 0 : i32
    %c0_i32_0 = arith.constant 0 : i32
    %c0_i32_1 = arith.constant 0 : i32
    return %c0_i32, %c0_i32_0 : i32, i32
  }
  func.func @transform_5(%arg0: i32, %arg1: i32) -> (i32, i32) {
    %c0_i32 = arith.constant 0 : i32
    %c0_i32_0 = arith.constant 0 : i32
    return %arg0, %c0_i32 : i32, i32
  }
}

</mosaic_0001>

<bundles_post_ra>
// kernel: _resnet_stack_forward.1
= control target key start
LH: loop header
LB: loop body
LE: loop exit
PB: predicated region body
PF: predicated region fallthrough
CT: control target
= control target key end

     0   :  { %s2977_s18 = smov 0   ;;  %s2979_s19 = smov 0   ;;  %s3476_s0 = inlined_call_operand.vmem [shape: bf16[8,256,128], index: 0, kind: input, shape index: {}]   ;;  %s3477_s1 = inlined_call_operand.vmem [shape: bf16[128,128], index: 1, kind: input, shape index: {}]   ;;  %s3478_s2 = inlined_call_operand.vmem [shape: f32[1,128], index: 2, kind: input, shape index: {}]   ;;  %s3479_s3 = inlined_call_operand.vmem [shape: f32[128,128], index: 3, kind: input, shape index: {}]   ;;  %s3480_s4 = inlined_call_operand.vmem [shape: f32[1,128], index: 4, kind: input, shape index: {}]   ;;  %s3481_s5 = inlined_call_operand.vmem [shape: f32[8,128], index: 5, kind: output, shape index: {}]  }
   0x1   :  { %s2981_s20 = smov 0   ;;  %s2983_s21 = smov 0  }
   0x2   :  { %s2985_s22 = smov 0  }
   0x3 LB: > { %s24_s23 = sadd.s32 1, %s2938_s21  ;;  %p43_p1 = scmp.ne.s32.totalorder %s2930_s19, %s2926_s18  ;;  %s2942_s22 = sphi %s2985_s22, %s15_s22   ;;  %s2938_s21 = sphi %s2983_s21, %s3485_s21   ;;  %s2934_s20 = sphi %s2981_s20, %s3484_s20   ;;  %s2930_s19 = sphi %s2979_s19, %s3483_s19   ;;  %s2926_s18 = sphi %s2977_s18, %s3482_s18  }
   0x4   : > { %p25_p0 = scmp.ge.s32.totalorder %s24_s23, 2  ;;  %p44_p2 = scmp.eq.s32.totalorder %s2942_s22, 0 }
   0x5   : > { %s36_s25 = sadd.s32 1, %s2930_s19  ;;  %p2419_p5 = scmp.ge.s32.totalorder %s2942_s22, 2 }
   0x6   : > { %s3487_s23 = smov (%p25_p0, %s24_s23), 0  ;;  %p45_p3 = por %p44_p2, %p43_p1 }
   0x7   : > { %s32_s24 = ssub.s32 %s2938_s21, %s3487_s23  ;;  %191 = sbr.rel (%p2419_p5) target bundleno = 48 (0x30), region = 32 }
   0x8   : > { %p34_p4 = scmp.eq.s32.totalorder %s32_s24, 0 }
   0xa   : > { %s3012_s26 = scalar_select %p34_p4, %s2930_s19, %s36_s25  }
   0xc   : > { %194 = sbr.rel (!%p45_p3) target bundleno = 48 (0x30), region = 36  ;;  %s196_s27 = sand.u32 (%p45_p3), 1, %s2930_s19  }
   0xd   : > { %s2504_s28 = sshll.u32 (%p45_p3), %s2938_s21, 6  ;;  %s2420_s29 = sshll.u32 (%p45_p3), %s196_s27, 9 }
   0xe   : > { %s3020_s7 = scalar_lea.vmem (%p45_p3), %s3476_s0, %s2504_s28  ;;  %s3025_s8 = scalar_lea.vmem (%p45_p3), [#allocation3], %s2420_s29 }
   0xf   : > { %v221_v0 = vld [vmem:[%s3020_s7] sm:$0xff] (%p45_p3)   ;;  %v225_v1 = vld [vmem:[%s3020_s7 + $0x8] sm:$0xff] (%p45_p3)   ;;  %v229_v2 = vld [vmem:[%s3020_s7 + $0x10] sm:$0xff] (%p45_p3)  }
  0x10   : > { %222 = vst [vmem:[%s3025_s8] sm:$0xff] (%p45_p3), %v221_v0   ;;  %226 = vst [vmem:[%s3025_s8 + $0x8] sm:$0xff] (%p45_p3), %v225_v1   ;;  %v233_v3 = vld [vmem:[%s3020_s7 + $0x18] sm:$0xff] (%p45_p3)   ;;  %v237_v4 = vld [vmem:[%s3020_s7 + $0x20] sm:$0xff] (%p45_p3)  }
  0x11   : > { %230 = vst [vmem:[%s3025_s8 + $0x10] sm:$0xff] %v229_v2   ;;  %v241_v5 = vld [vmem:[%s3020_s7 + $0x28] sm:$0xff]   ;;  %234 = vst [vmem:[%s3025_s8 + $0x18] sm:$0xff] %v233_v3   ;;  %v245_v6 = vld [vmem:[%s3020_s7 + $0x30] sm:$0xff]  }
  0x12   : > { %238 = vst [vmem:[%s3025_s8 + $0x20] sm:$0xff] %v237_v4   ;;  %242 = vst [vmem:[%s3025_s8 + $0x28] sm:$0xff] %v241_v5   ;;  %v249_v7 = vld [vmem:[%s3020_s7 + $0x38] sm:$0xff]   ;;  %v253_v8 = vld [vmem:[%s3020_s7 + $0x80] sm:$0xff]  }
  0x13   : > { %246 = vst [vmem:[%s3025_s8 + $0x30] sm:$0xff] %v245_v6   ;;  %250 = vst [vmem:[%s3025_s8 + $0x38] sm:$0xff] %v249_v7   ;;  %v257_v9 = vld [vmem:[%s3020_s7 + $0x88] sm:$0xff]   ;;  %v261_v10 = vld [vmem:[%s3020_s7 + $0x90] sm:$0xff]  }
  0x14   : > { %254 = vst [vmem:[%s3025_s8 + $0x40] sm:$0xff] %v253_v8   ;;  %v265_v11 = vld [vmem:[%s3020_s7 + $0x98] sm:$0xff]   ;;  %258 = vst [vmem:[%s3025_s8 + $0x48] sm:$0xff] %v257_v9   ;;  %v269_v12 = vld [vmem:[%s3020_s7 + $0xa0] sm:$0xff]  }
  0x15   : > { %262 = vst [vmem:[%s3025_s8 + $0x50] sm:$0xff] %v261_v10   ;;  %266 = vst [vmem:[%s3025_s8 + $0x58] sm:$0xff] %v265_v11   ;;  %v273_v13 = vld [vmem:[%s3020_s7 + $0xa8] sm:$0xff]   ;;  %v277_v14 = vld [vmem:[%s3020_s7 + $0xb0] sm:$0xff]  }
  0x16   : > { %270 = vst [vmem:[%s3025_s8 + $0x60] sm:$0xff] %v269_v12   ;;  %274 = vst [vmem:[%s3025_s8 + $0x68] sm:$0xff] %v273_v13   ;;  %v281_v15 = vld [vmem:[%s3020_s7 + $0xb8] sm:$0xff]   ;;  %v285_v16 = vld [vmem:[%s3020_s7 + $0x100] sm:$0xff]  }
  0x17   : > { %278 = vst [vmem:[%s3025_s8 + $0x70] sm:$0xff] %v277_v14   ;;  %v289_v17 = vld [vmem:[%s3020_s7 + $0x108] sm:$0xff]   ;;  %282 = vst [vmem:[%s3025_s8 + $0x78] sm:$0xff] %v281_v15   ;;  %v293_v18 = vld [vmem:[%s3020_s7 + $0x110] sm:$0xff]  }
  0x18   : > { %286 = vst [vmem:[%s3025_s8 + $0x80] sm:$0xff] %v285_v16   ;;  %290 = vst [vmem:[%s3025_s8 + $0x88] sm:$0xff] %v289_v17   ;;  %v297_v19 = vld [vmem:[%s3020_s7 + $0x118] sm:$0xff]   ;;  %v301_v20 = vld [vmem:[%s3020_s7 + $0x120] sm:$0xff]  }
  0x19   : > { %294 = vst [vmem:[%s3025_s8 + $0x90] sm:$0xff] %v293_v18   ;;  %298 = vst [vmem:[%s3025_s8 + $0x98] sm:$0xff] %v297_v19   ;;  %v305_v21 = vld [vmem:[%s3020_s7 + $0x128] sm:$0xff]   ;;  %v309_v22 = vld [vmem:[%s3020_s7 + $0x130] sm:$0xff]  }
  0x1a   : > { %302 = vst [vmem:[%s3025_s8 + $0xa0] sm:$0xff] %v301_v20   ;;  %v313_v23 = vld [vmem:[%s3020_s7 + $0x138] sm:$0xff]   ;;  %306 = vst [vmem:[%s3025_s8 + $0xa8] sm:$0xff] %v305_v21   ;;  %v317_v24 = vld [vmem:[%s3020_s7 + $0x180] sm:$0xff]  }
  0x1b   : > { %310 = vst [vmem:[%s3025_s8 + $0xb0] sm:$0xff] %v309_v22   ;;  %314 = vst [vmem:[%s3025_s8 + $0xb8] sm:$0xff] %v313_v23   ;;  %v321_v25 = vld [vmem:[%s3020_s7 + $0x188] sm:$0xff]   ;;  %v325_v26 = vld [vmem:[%s3020_s7 + $0x190] sm:$0xff]  }
  0x1c   : > { %318 = vst [vmem:[%s3025_s8 + $0xc0] sm:$0xff] %v317_v24   ;;  %322 = vst [vmem:[%s3025_s8 + $0xc8] sm:$0xff] %v321_v25   ;;  %v329_v27 = vld [vmem:[%s3020_s7 + $0x198] sm:$0xff]   ;;  %v333_v28 = vld [vmem:[%s3020_s7 + $0x1a0] sm:$0xff]  }
  0x1d   : > { %326 = vst [vmem:[%s3025_s8 + $0xd0] sm:$0xff] %v325_v26   ;;  %v337_v29 = vld [vmem:[%s3020_s7 + $0x1a8] sm:$0xff]   ;;  %330 = vst [vmem:[%s3025_s8 + $0xd8] sm:$0xff] %v329_v27   ;;  %v341_v30 = vld [vmem:[%s3020_s7 + $0x1b0] sm:$0xff]  }
  0x1e   : > { %334 = vst [vmem:[%s3025_s8 + $0xe0] sm:$0xff] %v333_v28   ;;  %338 = vst [vmem:[%s3025_s8 + $0xe8] sm:$0xff] %v337_v29   ;;  %v345_v31 = vld [vmem:[%s3020_s7 + $0x1b8] sm:$0xff]   ;;  %v349_v32 = vld [vmem:[%s3020_s7 + $0x200] sm:$0xff]  }
  0x1f   : > { %342 = vst [vmem:[%s3025_s8 + $0xf0] sm:$0xff] %v341_v30   ;;  %346 = vst [vmem:[%s3025_s8 + $0xf8] sm:$0xff] %v345_v31   ;;  %v353_v33 = vld [vmem:[%s3020_s7 + $0x208] sm:$0xff]   ;;  %v357_v34 = vld [vmem:[%s3020_s7 + $0x210] sm:$0xff]  }
  0x20   : > { %350 = vst [vmem:[%s3025_s8 + $0x100] sm:$0xff] %v349_v32   ;;  %v361_v35 = vld [vmem:[%s3020_s7 + $0x218] sm:$0xff]   ;;  %354 = vst [vmem:[%s3025_s8 + $0x108] sm:$0xff] %v353_v33   ;;  %v365_v36 = vld [vmem:[%s3020_s7 + $0x220] sm:$0xff]  }
  0x21   : > { %358 = vst [vmem:[%s3025_s8 + $0x110] sm:$0xff] %v357_v34   ;;  %362 = vst [vmem:[%s3025_s8 + $0x118] sm:$0xff] %v361_v35   ;;  %v369_v37 = vld [vmem:[%s3020_s7 + $0x228] sm:$0xff]   ;;  %v373_v38 = vld [vmem:[%s3020_s7 + $0x230] sm:$0xff]  }
  0x22   : > { %366 = vst [vmem:[%s3025_s8 + $0x120] sm:$0xff] %v365_v36   ;;  %370 = vst [vmem:[%s3025_s8 + $0x128] sm:$0xff] %v369_v37   ;;  %v377_v39 = vld [vmem:[%s3020_s7 + $0x238] sm:$0xff]   ;;  %v381_v40 = vld [vmem:[%s3020_s7 + $0x280] sm:$0xff]  }
  0x23   : > { %374 = vst [vmem:[%s3025_s8 + $0x130] sm:$0xff] %v373_v38   ;;  %v385_v41 = vld [vmem:[%s3020_s7 + $0x288] sm:$0xff]   ;;  %378 = vst [vmem:[%s3025_s8 + $0x138] sm:$0xff] %v377_v39   ;;  %v389_v42 = vld [vmem:[%s3020_s7 + $0x290] sm:$0xff]  }
  0x24   : > { %382 = vst [vmem:[%s3025_s8 + $0x140] sm:$0xff] %v381_v40   ;;  %386 = vst [vmem:[%s3025_s8 + $0x148] sm:$0xff] %v385_v41   ;;  %v393_v43 = vld [vmem:[%s3020_s7 + $0x298] sm:$0xff]   ;;  %v397_v44 = vld [vmem:[%s3020_s7 + $0x2a0] sm:$0xff]  }
  0x25   : > { %390 = vst [vmem:[%s3025_s8 + $0x150] sm:$0xff] %v389_v42   ;;  %394 = vst [vmem:[%s3025_s8 + $0x158] sm:$0xff] %v393_v43   ;;  %v401_v45 = vld [vmem:[%s3020_s7 + $0x2a8] sm:$0xff]   ;;  %v405_v46 = vld [vmem:[%s3020_s7 + $0x2b0] sm:$0xff]  }
  0x26   : > { %398 = vst [vmem:[%s3025_s8 + $0x160] sm:$0xff] %v397_v44   ;;  %v409_v47 = vld [vmem:[%s3020_s7 + $0x2b8] sm:$0xff]   ;;  %402 = vst [vmem:[%s3025_s8 + $0x168] sm:$0xff] %v401_v45   ;;  %v413_v48 = vld [vmem:[%s3020_s7 + $0x300] sm:$0xff]  }
  0x27   : > { %406 = vst [vmem:[%s3025_s8 + $0x170] sm:$0xff] %v405_v46   ;;  %410 = vst [vmem:[%s3025_s8 + $0x178] sm:$0xff] %v409_v47   ;;  %v417_v49 = vld [vmem:[%s3020_s7 + $0x308] sm:$0xff]   ;;  %v421_v50 = vld [vmem:[%s3020_s7 + $0x310] sm:$0xff]  }
  0x28   : > { %414 = vst [vmem:[%s3025_s8 + $0x180] sm:$0xff] %v413_v48   ;;  %418 = vst [vmem:[%s3025_s8 + $0x188] sm:$0xff] %v417_v49   ;;  %v425_v51 = vld [vmem:[%s3020_s7 + $0x318] sm:$0xff]   ;;  %v429_v52 = vld [vmem:[%s3020_s7 + $0x320] sm:$0xff]  }
  0x29   : > { %422 = vst [vmem:[%s3025_s8 + $0x190] sm:$0xff] %v421_v50   ;;  %v433_v53 = vld [vmem:[%s3020_s7 + $0x328] sm:$0xff]   ;;  %426 = vst [vmem:[%s3025_s8 + $0x198] sm:$0xff] %v425_v51   ;;  %v437_v54 = vld [vmem:[%s3020_s7 + $0x330] sm:$0xff]  }
  0x2a   : > { %430 = vst [vmem:[%s3025_s8 + $0x1a0] sm:$0xff] %v429_v52   ;;  %434 = vst [vmem:[%s3025_s8 + $0x1a8] sm:$0xff] %v433_v53   ;;  %v441_v55 = vld [vmem:[%s3020_s7 + $0x338] sm:$0xff]   ;;  %v445_v56 = vld [vmem:[%s3020_s7 + $0x380] sm:$0xff]  }
  0x2b   : > { %438 = vst [vmem:[%s3025_s8 + $0x1b0] sm:$0xff] %v437_v54   ;;  %442 = vst [vmem:[%s3025_s8 + $0x1b8] sm:$0xff] %v441_v55   ;;  %v449_v57 = vld [vmem:[%s3020_s7 + $0x388] sm:$0xff]   ;;  %v453_v58 = vld [vmem:[%s3020_s7 + $0x390] sm:$0xff]  }
  0x2c   : > { %446 = vst [vmem:[%s3025_s8 + $0x1c0] sm:$0xff] %v445_v56   ;;  %v457_v59 = vld [vmem:[%s3020_s7 + $0x398] sm:$0xff]   ;;  %450 = vst [vmem:[%s3025_s8 + $0x1c8] sm:$0xff] %v449_v57   ;;  %v461_v60 = vld [vmem:[%s3020_s7 + $0x3a0] sm:$0xff]  }
  0x2d   : > { %454 = vst [vmem:[%s3025_s8 + $0x1d0] sm:$0xff] %v453_v58   ;;  %458 = vst [vmem:[%s3025_s8 + $0x1d8] sm:$0xff] %v457_v59   ;;  %v465_v61 = vld [vmem:[%s3020_s7 + $0x3a8] sm:$0xff]   ;;  %v469_v62 = vld [vmem:[%s3020_s7 + $0x3b0] sm:$0xff]  }
  0x2e   : > { %462 = vst [vmem:[%s3025_s8 + $0x1e0] sm:$0xff] %v461_v60   ;;  %466 = vst [vmem:[%s3025_s8 + $0x1e8] sm:$0xff] %v465_v61   ;;  %v473_v63 = vld [vmem:[%s3020_s7 + $0x3b8] sm:$0xff]  }
  0x2f   : > { %470 = vst [vmem:[%s3025_s8 + $0x1f0] sm:$0xff] %v469_v62   ;;  %474 = vst [vmem:[%s3025_s8 + $0x1f8] sm:$0xff] %v473_v63  }
  0x30 PF: > { %p2423_p6 = scmp.ge.s32.totalorder %s2942_s22, 1  ;;  %p755_p7 = scmp.lt.s32.totalorder %s2942_s22, 3 }
  0x32   : > { %p756_p8 = pnand %p2423_p6, %p755_p7 }
  0x33   : > { %s762_s9 = sand.u32 (!%p756_p8), 1, %s2926_s18   ;;  %p2425_p9 = scmp.ne.s32.totalorder (!%p756_p8), %s2934_s20, 0 }
  0x34   : > { %759 = sbr.rel (%p756_p8) target bundleno = 675 (0x2a3), region = 77  ;;  %s2424_s10 = sshll.u32 (!%p756_p8), %s762_s9, 9 }
  0x35   : > { %s3155_s11 = scalar_lea.vmem (!%p756_p8), [#allocation3], %s2424_s10 }
  0x39   : > { %798 = sbr.rel (%p2425_p9) target bundleno = 64 (0x40), region = 85 }
  0x3e   : > { %v2944_v0 = vmov 0.0  }
  0x3f   : > { %799 = vst [vmem:[#allocation2] sm:$0xff] %v2944_v0 }
  0x40 PF: > { %v2832_v1 = vld [vmem:[%s3477_s1 + $0x38] sm:$0xff]   ;;  %v2833_v2 = vld [vmem:[%s3477_s1 + $0x30] sm:$0xff]   ;;  %v2834_v3 = vld [vmem:[%s3477_s1 + $0x28] sm:$0xff]   ;;  %vm2233_vm0 = vcmask 1041409   ;;  %vm2235_vm1 = vcmask 1042434   ;;  %vm2237_vm2 = vcmask 1043459  }
  0x41   : > { %2594 = vmatprep.subr.bf16.mxu0 %v2832_v1  ;;  %2773 = vmatprep.subr.bf16.mxu1 %v2832_v1  ;;  %v2835_v4 = vld [vmem:[%s3477_s1 + $0x20] sm:$0xff]   ;;  %v2840_v5 = vld [vmem:[%s3155_s11] sm:$0xff]   ;;  %v2836_v7 = vld [vmem:[%s3477_s1 + $0x18] sm:$0xff]   ;;  %vm2239_vm3 = vcmask 1044484   ;;  %vm2241_vm4 = vcmask 1045509   ;;  %vm2243_vm5 = vcmask 1046534  }
  0x42   : > { %2595 = vmatpush3.bf16.msra.mxu0 %v2832_v1  ;;  %2781 = vmatpush3.bf16.msra.mxu1 %v2832_v1  ;;  %v2841_v6 = vld [vmem:[%s3155_s11 + $0x100] sm:$0xff]   ;;  %v2837_v8 = vld [vmem:[%s3477_s1 + $0x10] sm:$0xff]   ;;  %v2839_v10 = vld [vmem:[%s3477_s1] sm:$0xff]   ;;  %vm2245_vm6 = vcmask 1047559   ;;  %p2499_p10 = scmp.ne.s32.totalorder %s2934_s20, 1 }
  0x43   : > { %2596 = vmatprep.subr.bf16.mxu0 %v2833_v2  ;;  %2774 = vmatprep.subr.bf16.mxu1 %v2833_v2  ;;  %v2838_v9 = vld [vmem:[%s3477_s1 + $0x8] sm:$0xff]   ;;  %v2842_v11 = vld [vmem:[%s3155_s11 + $0x8] sm:$0xff]   ;;  %v2844_v13 = vld [vmem:[%s3155_s11 + $0x10] sm:$0xff]  }
  0x44   : > { %2610 = vmatprep.mubr.bf16.mxu0 %v2840_v5  ;;  %2674 = vmatprep.mubr.bf16.mxu1 %v2841_v6  ;;  %v2843_v12 = vld [vmem:[%s3155_s11 + $0x108] sm:$0xff]   ;;  %v2845_v14 = vld [vmem:[%s3155_s11 + $0x110] sm:$0xff]   ;;  %v2846_v15 = vld [vmem:[%s3155_s11 + $0x18] sm:$0xff]  }
  0x45   : > { %v2847_v16 = vld [vmem:[%s3155_s11 + $0x118] sm:$0xff]   ;;  %v2848_v17 = vld [vmem:[%s3155_s11 + $0x20] sm:$0xff]   ;;  %v2850_v19 = vld [vmem:[%s3155_s11 + $0x28] sm:$0xff]  }
  0x46   : > { %2597 = vmatpush3.bf16.msra.mxu0 %v2833_v2  ;;  %2782 = vmatpush3.bf16.msra.mxu1 %v2833_v2  ;;  %v2849_v18 = vld [vmem:[%s3155_s11 + $0x120] sm:$0xff]   ;;  %v2851_v20 = vld [vmem:[%s3155_s11 + $0x128] sm:$0xff]   ;;  %v2852_v21 = vld [vmem:[%s3155_s11 + $0x30] sm:$0xff]  }
  0x47   : > { %2598 = vmatprep.subr.bf16.mxu0 %v2834_v3  ;;  %2775 = vmatprep.subr.bf16.mxu1 %v2834_v3  ;;  %v2853_v22 = vld [vmem:[%s3155_s11 + $0x130] sm:$0xff]   ;;  %v2854_v23 = vld [vmem:[%s3155_s11 + $0x38] sm:$0xff]   ;;  %v2856_v25 = vld [vmem:[%s3155_s11 + $0x40] sm:$0xff]  }
  0x48   : > { %v2855_v24 = vld [vmem:[%s3155_s11 + $0x138] sm:$0xff]   ;;  %v2857_v26 = vld [vmem:[%s3155_s11 + $0x140] sm:$0xff]   ;;  %v2858_v27 = vld [vmem:[%s3155_s11 + $0x48] sm:$0xff]  }
  0x49   : > { %v2859_v28 = vld [vmem:[%s3155_s11 + $0x148] sm:$0xff]   ;;  %v2860_v29 = vld [vmem:[%s3155_s11 + $0x50] sm:$0xff]   ;;  %v2862_v31 = vld [vmem:[%s3155_s11 + $0x58] sm:$0xff]  }
  0x4a   : > { %2599 = vmatpush3.bf16.msra.mxu0 %v2834_v3  ;;  %2783 = vmatpush3.bf16.msra.mxu1 %v2834_v3  ;;  %v2861_v30 = vld [vmem:[%s3155_s11 + $0x150] sm:$0xff]   ;;  %v2863_v32 = vld [vmem:[%s3155_s11 + $0x158] sm:$0xff]   ;;  %v2864_v33 = vld [vmem:[%s3155_s11 + $0x60] sm:$0xff]  }
  0x4b   : > { %2600 = vmatprep.subr.bf16.mxu0 %v2835_v4  ;;  %2776 = vmatprep.subr.bf16.mxu1 %v2835_v4  ;;  %v2865_v34 = vld [vmem:[%s3155_s11 + $0x160] sm:$0xff]   ;;  %v2866_v35 = vld [vmem:[%s3155_s11 + $0x68] sm:$0xff]   ;;  %v2868_v37 = vld [vmem:[%s3155_s11 + $0x70] sm:$0xff]  }
  0x4c   : > { %v2867_v36 = vld [vmem:[%s3155_s11 + $0x168] sm:$0xff]   ;;  %v2869_v38 = vld [vmem:[%s3155_s11 + $0x170] sm:$0xff]   ;;  %v2870_v39 = vld [vmem:[%s3155_s11 + $0x78] sm:$0xff]  }
  0x4d   : > { %v2871_v40 = vld [vmem:[%s3155_s11 + $0x178] sm:$0xff]   ;;  %v2872_v41 = vld [vmem:[%s3155_s11 + $0x80] sm:$0xff]   ;;  %v2874_v43 = vld [vmem:[%s3155_s11 + $0x88] sm:$0xff]  }
  0x4e   : > { %2601 = vmatpush3.bf16.msra.mxu0 %v2835_v4  ;;  %2784 = vmatpush3.bf16.msra.mxu1 %v2835_v4  ;;  %v2873_v42 = vld [vmem:[%s3155_s11 + $0x180] sm:$0xff]   ;;  %v2875_v44 = vld [vmem:[%s3155_s11 + $0x188] sm:$0xff]   ;;  %v2876_v45 = vld [vmem:[%s3155_s11 + $0x90] sm:$0xff]  }
  0x4f   : > { %2602 = vmatprep.subr.bf16.mxu0 %v2836_v7  ;;  %2777 = vmatprep.subr.bf16.mxu1 %v2836_v7  ;;  %v2877_v46 = vld [vmem:[%s3155_s11 + $0x190] sm:$0xff]   ;;  %v2878_v47 = vld [vmem:[%s3155_s11 + $0x98] sm:$0xff]   ;;  %v2880_v49 = vld [vmem:[%s3155_s11 + $0xa0] sm:$0xff]  }
  0x50   : > { %v2879_v48 = vld [vmem:[%s3155_s11 + $0x198] sm:$0xff]   ;;  %v2881_v50 = vld [vmem:[%s3155_s11 + $0x1a0] sm:$0xff]   ;;  %v2882_v51 = vld [vmem:[%s3155_s11 + $0xa8] sm:$0xff]  }
  0x51   : > { %v2883_v52 = vld [vmem:[%s3155_s11 + $0x1a8] sm:$0xff]   ;;  %v2884_v53 = vld [vmem:[%s3155_s11 + $0xb0] sm:$0xff]   ;;  %v2886_v55 = vld [vmem:[%s3155_s11 + $0xb8] sm:$0xff]  }
  0x52   : > { %2603 = vmatpush3.bf16.msra.mxu0 %v2836_v7  ;;  %2785 = vmatpush3.bf16.msra.mxu1 %v2836_v7  ;;  %v2885_v54 = vld [vmem:[%s3155_s11 + $0x1b0] sm:$0xff]   ;;  %v2887_v56 = vld [vmem:[%s3155_s11 + $0x1b8] sm:$0xff]   ;;  %v2888_v57 = vld [vmem:[%s3155_s11 + $0xc0] sm:$0xff]  }
  0x53   : > { %2604 = vmatprep.subr.bf16.mxu0 %v2837_v8  ;;  %2778 = vmatprep.subr.bf16.mxu1 %v2837_v8  ;;  %v2889_v58 = vld [vmem:[%s3155_s11 + $0x1c0] sm:$0xff]   ;;  %v2890_v59 = vld [vmem:[%s3155_s11 + $0xc8] sm:$0xff]   ;;  %v2892_v61 = vld [vmem:[%s3155_s11 + $0xd0] sm:$0xff]  }
  0x54   : > { %v2891_v60 = vld [vmem:[%s3155_s11 + $0x1c8] sm:$0xff]   ;;  %v2893_v62 = vld [vmem:[%s3155_s11 + $0x1d0] sm:$0xff]   ;;  %v2894_v63 = vld [vmem:[%s3155_s11 + $0xd8] sm:$0xff]  }
  0x55   : > { %v2895_v0 = vld [vmem:[%s3155_s11 + $0x1d8] sm:$0xff]   ;;  %v2896_v1 = vld [vmem:[%s3155_s11 + $0xe0] sm:$0xff]   ;;  %v2898_v3 = vld [vmem:[%s3155_s11 + $0xe8] sm:$0xff]  }
  0x56   : > { %2605 = vmatpush3.bf16.msra.mxu0 %v2837_v8  ;;  %2786 = vmatpush3.bf16.msra.mxu1 %v2837_v8  ;;  %v2897_v2 = vld [vmem:[%s3155_s11 + $0x1e0] sm:$0xff]   ;;  %v2899_v4 = vld [vmem:[%s3155_s11 + $0x1e8] sm:$0xff]   ;;  %v2900_v5 = vld [vmem:[%s3155_s11 + $0xf0] sm:$0xff]  }
  0x57   : > { %2606 = vmatprep.subr.bf16.mxu0 %v2838_v9  ;;  %2779 = vmatprep.subr.bf16.mxu1 %v2838_v9  ;;  %v2901_v6 = vld [vmem:[%s3155_s11 + $0x1f0] sm:$0xff]   ;;  %v2902_v7 = vld [vmem:[%s3155_s11 + $0xf8] sm:$0xff]  }
  0x58   : > { %v2903_v8 = vld [vmem:[%s3155_s11 + $0x1f8] sm:$0xff]  }
  0x5a   : > { %2607 = vmatpush3.bf16.msra.mxu0 %v2838_v9  ;;  %2787 = vmatpush3.bf16.msra.mxu1 %v2838_v9 }
  0x5b   : > { %2608 = vmatprep.subr.bf16.mxu0 %v2839_v10  ;;  %2780 = vmatprep.subr.bf16.mxu1 %v2839_v10 }
  0x5e   : > { %2609 = vmatpush3.bf16.msra.mxu0 %v2839_v10  ;;  %2788 = vmatpush3.bf16.msra.mxu1 %v2839_v10 }
  0x61   : > { %2611 = vmatmul.mubr.bf16.vlgmr.msra.gmra.mxu0 %v2842_v11  ;;  %2675 = vmatmul.mubr.bf16.vlgmr.msra.gmra.mxu1 %v2843_v12 }
  0x62   : > { %2614 = vmatprep.mubr.bf16.mxu0 %v2844_v13  ;;  %2678 = vmatprep.mubr.bf16.mxu1 %v2845_v14  ;;  %v3249_v13 = vld [vmem:[%s3478_s2] ss:$0 sm:$0xff] }
  0x69   : > { %2615 = vmatmul.mubr.bf16.gmra.mxu0 %v2846_v15  ;;  %2679 = vmatmul.mubr.bf16.gmra.mxu1 %v2847_v16 }
  0x6a   : > { %2618 = vmatprep.mubr.bf16.mxu0 %v2848_v17  ;;  %2682 = vmatprep.mubr.bf16.mxu1 %v2849_v18 }
  0x71   : > { %2619 = vmatmul.mubr.bf16.gmra.mxu0 %v2850_v19  ;;  %2683 = vmatmul.mubr.bf16.gmra.mxu1 %v2851_v20 }
  0x72   : > { %2622 = vmatprep.mubr.bf16.mxu0 %v2852_v21  ;;  %2686 = vmatprep.mubr.bf16.mxu1 %v2853_v22 }
  0x79   : > { %2623 = vmatmul.mubr.bf16.gmra.mxu0 %v2854_v23  ;;  %2687 = vmatmul.mubr.bf16.gmra.mxu1 %v2855_v24 }
  0x7a   : > { %2626 = vmatprep.mubr.bf16.mxu0 %v2856_v25  ;;  %2690 = vmatprep.mubr.bf16.mxu1 %v2857_v26 }
  0x81   : > { %2627 = vmatmul.mubr.bf16.gmra.mxu0 %v2858_v27  ;;  %2691 = vmatmul.mubr.bf16.gmra.mxu1 %v2859_v28 }
  0x82   : > { %2630 = vmatprep.mubr.bf16.mxu0 %v2860_v29  ;;  %2694 = vmatprep.mubr.bf16.mxu1 %v2861_v30 }
  0x89   : > { %2631 = vmatmul.mubr.bf16.gmra.mxu0 %v2862_v31  ;;  %2695 = vmatmul.mubr.bf16.gmra.mxu1 %v2863_v32 }
  0x8a   : > { %2634 = vmatprep.mubr.bf16.mxu0 %v2864_v33  ;;  %2698 = vmatprep.mubr.bf16.mxu1 %v2865_v34 }
  0x91   : > { %2635 = vmatmul.mubr.bf16.gmra.mxu0 %v2866_v35  ;;  %2699 = vmatmul.mubr.bf16.gmra.mxu1 %v2867_v36 }
  0x92   : > { %2638 = vmatprep.mubr.bf16.mxu0 %v2868_v37  ;;  %2702 = vmatprep.mubr.bf16.mxu1 %v2869_v38 }
  0x99   : > { %2639 = vmatmul.mubr.bf16.gmra.mxu0 %v2870_v39  ;;  %2703 = vmatmul.mubr.bf16.gmra.mxu1 %v2871_v40 }
  0x9a   : > { %2642 = vmatprep.mubr.bf16.mxu0 %v2872_v41  ;;  %2706 = vmatprep.mubr.bf16.mxu1 %v2873_v42 }
  0xa1   : > { %2643 = vmatmul.mubr.bf16.gmra.mxu0 %v2874_v43  ;;  %2707 = vmatmul.mubr.bf16.gmra.mxu1 %v2875_v44 }
  0xa2   : > { %2646 = vmatprep.mubr.bf16.mxu0 %v2876_v45  ;;  %2710 = vmatprep.mubr.bf16.mxu1 %v2877_v46 }
  0xa9   : > { %2647 = vmatmul.mubr.bf16.gmra.mxu0 %v2878_v47  ;;  %2711 = vmatmul.mubr.bf16.gmra.mxu1 %v2879_v48 }
  0xaa   : > { %2650 = vmatprep.mubr.bf16.mxu0 %v2880_v49  ;;  %2714 = vmatprep.mubr.bf16.mxu1 %v2881_v50 }
  0xb1   : > { %2651 = vmatmul.mubr.bf16.gmra.mxu0 %v2882_v51  ;;  %2715 = vmatmul.mubr.bf16.gmra.mxu1 %v2883_v52 }
  0xb2   : > { %2654 = vmatprep.mubr.bf16.mxu0 %v2884_v53  ;;  %2718 = vmatprep.mubr.bf16.mxu1 %v2885_v54 }
  0xb9   : > { %2655 = vmatmul.mubr.bf16.gmra.mxu0 %v2886_v55  ;;  %2719 = vmatmul.mubr.bf16.gmra.mxu1 %v2887_v56 }
  0xba   : > { %2658 = vmatprep.mubr.bf16.mxu0 %v2888_v57  ;;  %2722 = vmatprep.mubr.bf16.mxu1 %v2889_v58 }
  0xc1   : > { %2659 = vmatmul.mubr.bf16.gmra.mxu0 %v2890_v59  ;;  %2723 = vmatmul.mubr.bf16.gmra.mxu1 %v2891_v60 }
  0xc2   : > { %2662 = vmatprep.mubr.bf16.mxu0 %v2892_v61  ;;  %2726 = vmatprep.mubr.bf16.mxu1 %v2893_v62 }
  0xc9   : > { %2663 = vmatmul.mubr.bf16.gmra.mxu0 %v2894_v63  ;;  %2727 = vmatmul.mubr.bf16.gmra.mxu1 %v2895_v0 }
  0xca   : > { %2666 = vmatprep.mubr.bf16.mxu0 %v2896_v1  ;;  %2730 = vmatprep.mubr.bf16.mxu1 %v2897_v2 }
  0xd1   : > { %2667 = vmatmul.mubr.bf16.gmra.mxu0 %v2898_v3  ;;  %2731 = vmatmul.mubr.bf16.gmra.mxu1 %v2899_v4 }
  0xd2   : > { %2670 = vmatprep.mubr.bf16.mxu0 %v2900_v5  ;;  %2734 = vmatprep.mubr.bf16.mxu1 %v2901_v6 }
  0xd9   : > { %2671 = vmatmul.mubr.bf16.gmra.mxu0 %v2902_v7  ;;  %2735 = vmatmul.mubr.bf16.gmra.mxu1 %v2903_v8 }
 0x121   : > { %v2612_v9 = vpop.f32.mrf.mxu0  ;;  %v2676_v10 = vpop.f32.mrf.mxu1 }
 0x122   : > { %v1426_v20 = vadd.f32 %v2612_v9, %v3249_v13  ;;  %v1682_v21 = vadd.f32 %v2676_v10, %v3249_v13 }
 0x123   : > { %v1417_v11 = vpop.f32.mrf.mxu0  ;;  %v1673_v12 = vpop.f32.mrf.mxu1 }
 0x124   : > { %v1418_v14 = vadd.f32 %v3249_v13, %v1417_v11  ;;  %v1674_v15 = vadd.f32 %v3249_v13, %v1673_v12  ;;  %v1930_v34 = vmax.f32 %v1426_v20, 0.0  ;;  %v1994_v35 = vmax.f32 %v1682_v21, 0.0 }
 0x125   : > { %v2613_v16 = vpop.f32.mrf.mxu0  ;;  %v2677_v17 = vpop.f32.mrf.mxu1 }
 0x126   : > { %v1928_v24 = vmax.f32 %v1418_v14, 0.0  ;;  %v1992_v25 = vmax.f32 %v1674_v15, 0.0  ;;  %v1429_v28 = vadd.f32 %v2613_v16, %v3249_v13  ;;  %v1685_v29 = vadd.f32 %v2677_v17, %v3249_v13 }
 0x127   : > { %v1420_v18 = vpop.f32.mrf.mxu0  ;;  %v1676_v19 = vpop.f32.mrf.mxu1 }
 0x128   : > { %v1421_v22 = vadd.f32 %v3249_v13, %v1420_v18  ;;  %v1677_v23 = vadd.f32 %v3249_v13, %v1676_v19  ;;  %v1931_v42 = vmax.f32 %v1429_v28, 0.0  ;;  %v1995_v43 = vmax.f32 %v1685_v29, 0.0 }
 0x129   : > { %v2616_v26 = vpop.f32.mrf.mxu0  ;;  %v2680_v27 = vpop.f32.mrf.mxu1 }
 0x12a   : > { %v1929_v30 = vmax.f32 %v1421_v22, 0.0  ;;  %v1993_v31 = vmax.f32 %v1677_v23, 0.0  ;;  %v1442_v49 = vadd.f32 %v2616_v26, %v3249_v13  ;;  %v1698_v53 = vadd.f32 %v2680_v27, %v3249_v13 }
 0x12b   : > { %v1433_v32 = vpop.f32.mrf.mxu0  ;;  %v1689_v33 = vpop.f32.mrf.mxu1 }
 0x12c   : > { %v2057_v36 = vadd.f32 %v1929_v30, %v1928_v24  ;;  %v2141_v37 = vadd.f32 %v1993_v31, %v1992_v25  ;;  %v1434_v38 = vadd.f32 %v3249_v13, %v1433_v32  ;;  %v1690_v39 = vadd.f32 %v3249_v13, %v1689_v33 }
 0x12d   : > { %v2617_v40 = vpop.f32.mrf.mxu0  ;;  %v2681_v41 = vpop.f32.mrf.mxu1  ;;  %v1934_v2 = vmax.f32 %v1442_v49, 0.0  ;;  %v1998_v4 = vmax.f32 %v1698_v53, 0.0 }
 0x12e   : > { %v2058_v44 = vadd.f32 %v2057_v36, %v1930_v34  ;;  %v2142_v45 = vadd.f32 %v2141_v37, %v1994_v35  ;;  %v1996_v46 = vmax.f32 %v1690_v39, 0.0  ;;  %v1932_v50 = vmax.f32 %v1434_v38, 0.0 }
 0x12f   : > { %v1436_v47 = vpop.f32.mrf.mxu0  ;;  %v1692_v48 = vpop.f32.mrf.mxu1  ;;  %v1445_v60 = vadd.f32 %v2617_v40, %v3249_v13  ;;  %v1701_v61 = vadd.f32 %v2681_v41, %v3249_v13 }
 0x130   : > { %v2059_v51 = vadd.f32 %v2058_v44, %v1931_v42  ;;  %v2143_v52 = vadd.f32 %v2142_v45, %v1995_v43  ;;  %v1437_v54 = vadd.f32 %v3249_v13, %v1436_v47  ;;  %v1693_v55 = vadd.f32 %v3249_v13, %v1692_v48 }
 0x131   : > { %v2620_v56 = vpop.f32.mrf.mxu0  ;;  %v2684_v57 = vpop.f32.mrf.mxu1  ;;  %v1935_v10 = vmax.f32 %v1445_v60, 0.0  ;;  %v1999_v11 = vmax.f32 %v1701_v61, 0.0 }
 0x132   : > { %v2060_v58 = vadd.f32 %v2059_v51, %v1932_v50  ;;  %v2144_v59 = vadd.f32 %v2143_v52, %v1996_v46  ;;  %v1933_v62 = vmax.f32 %v1437_v54, 0.0  ;;  %v1997_v63 = vmax.f32 %v1693_v55, 0.0 }
 0x133   : > { %v1449_v0 = vpop.f32.mrf.mxu0  ;;  %v1705_v1 = vpop.f32.mrf.mxu1  ;;  %v1458_v18 = vadd.f32 %v2620_v56, %v3249_v13  ;;  %v1714_v21 = vadd.f32 %v2684_v57, %v3249_v13 }
 0x134   : > { %v1706_v3 = vadd.f32 %v3249_v13, %v1705_v1  ;;  %v2061_v5 = vadd.f32 %v2060_v58, %v1933_v62  ;;  %v2145_v6 = vadd.f32 %v2144_v59, %v1997_v63  ;;  %v1450_v7 = vadd.f32 %v3249_v13, %v1449_v0 }
 0x135   : > { %v2621_v8 = vpop.f32.mrf.mxu0  ;;  %v2685_v9 = vpop.f32.mrf.mxu1  ;;  %v1938_v35 = vmax.f32 %v1458_v18, 0.0  ;;  %v2002_v37 = vmax.f32 %v1714_v21, 0.0 }
 0x136   : > { %v2062_v12 = vadd.f32 %v2061_v5, %v1934_v2  ;;  %v2146_v14 = vadd.f32 %v2145_v6, %v1998_v4  ;;  %v2000_v15 = vmax.f32 %v1706_v3, 0.0  ;;  %v1936_v22 = vmax.f32 %v1450_v7, 0.0 }
 0x137   : > { %v1452_v16 = vpop.f32.mrf.mxu0  ;;  %v1708_v17 = vpop.f32.mrf.mxu1  ;;  %v1461_v27 = vadd.f32 %v2621_v8, %v3249_v13  ;;  %v1717_v32 = vadd.f32 %v2685_v9, %v3249_v13 }
 0x138   : > { %v1453_v19 = vadd.f32 %v3249_v13, %v1452_v16  ;;  %v1709_v20 = vadd.f32 %v3249_v13, %v1708_v17  ;;  %v2063_v23 = vadd.f32 %v2062_v12, %v1935_v10  ;;  %v2147_v24 = vadd.f32 %v2146_v14, %v1999_v11 }
 0x139   : > { %v2624_v25 = vpop.f32.mrf.mxu0  ;;  %v2688_v26 = vpop.f32.mrf.mxu1  ;;  %v1939_v43 = vmax.f32 %v1461_v27, 0.0  ;;  %v2003_v44 = vmax.f32 %v1717_v32, 0.0 }
 0x13a   : > { %v1937_v28 = vmax.f32 %v1453_v19, 0.0  ;;  %v2001_v29 = vmax.f32 %v1709_v20, 0.0  ;;  %v2064_v30 = vadd.f32 %v2063_v23, %v1936_v22  ;;  %v2148_v31 = vadd.f32 %v2147_v24, %v2000_v15 }
 0x13b   : > { %v1465_v33 = vpop.f32.mrf.mxu0  ;;  %v1721_v34 = vpop.f32.mrf.mxu1  ;;  %v1474_v50 = vadd.f32 %v2624_v25, %v3249_v13  ;;  %v1730_v51 = vadd.f32 %v2688_v26, %v3249_v13 }
 0x13c   : > { %v1722_v36 = vadd.f32 %v3249_v13, %v1721_v34  ;;  %v2065_v38 = vadd.f32 %v2064_v30, %v1937_v28  ;;  %v2149_v39 = vadd.f32 %v2148_v31, %v2001_v29  ;;  %v1466_v40 = vadd.f32 %v3249_v13, %v1465_v33 }
 0x13d   : > { %v2625_v41 = vpop.f32.mrf.mxu0  ;;  %v2689_v42 = vpop.f32.mrf.mxu1  ;;  %v1942_v3 = vmax.f32 %v1474_v50, 0.0  ;;  %v2006_v4 = vmax.f32 %v1730_v51, 0.0 }
 0x13e   : > { %v2066_v45 = vadd.f32 %v2065_v38, %v1938_v35  ;;  %v2150_v46 = vadd.f32 %v2149_v39, %v2002_v37  ;;  %v2004_v47 = vmax.f32 %v1722_v36, 0.0  ;;  %v1940_v54 = vmax.f32 %v1466_v40, 0.0 }
 0x13f   : > { %v1468_v48 = vpop.f32.mrf.mxu0  ;;  %v1724_v49 = vpop.f32.mrf.mxu1  ;;  %v1477_v63 = vadd.f32 %v2625_v41, %v3249_v13  ;;  %v1733_v0 = vadd.f32 %v2689_v42, %v3249_v13 }
 0x140   : > { %v1469_v52 = vadd.f32 %v3249_v13, %v1468_v48  ;;  %v1725_v53 = vadd.f32 %v3249_v13, %v1724_v49  ;;  %v2067_v55 = vadd.f32 %v2066_v45, %v1939_v43  ;;  %v2151_v56 = vadd.f32 %v2150_v46, %v2003_v44 }
 0x141   : > { %v2628_v57 = vpop.f32.mrf.mxu0  ;;  %v2692_v58 = vpop.f32.mrf.mxu1  ;;  %v1943_v11 = vmax.f32 %v1477_v63, 0.0  ;;  %v2007_v12 = vmax.f32 %v1733_v0, 0.0 }
 0x142   : > { %v1941_v59 = vmax.f32 %v1469_v52, 0.0  ;;  %v2005_v60 = vmax.f32 %v1725_v53, 0.0  ;;  %v2068_v61 = vadd.f32 %v2067_v55, %v1940_v54  ;;  %v2152_v62 = vadd.f32 %v2151_v56, %v2004_v47 }
 0x143   : > { %v1481_v1 = vpop.f32.mrf.mxu0  ;;  %v1737_v2 = vpop.f32.mrf.mxu1  ;;  %v1490_v18 = vadd.f32 %v2628_v57, %v3249_v13  ;;  %v1746_v19 = vadd.f32 %v2692_v58, %v3249_v13 }
 0x144   : > { %v2069_v5 = vadd.f32 %v2068_v61, %v1941_v59  ;;  %v2153_v6 = vadd.f32 %v2152_v62, %v2005_v60  ;;  %v1482_v7 = vadd.f32 %v3249_v13, %v1481_v1  ;;  %v1738_v8 = vadd.f32 %v3249_v13, %v1737_v2 }
 0x145   : > { %v2629_v9 = vpop.f32.mrf.mxu0  ;;  %v2693_v10 = vpop.f32.mrf.mxu1  ;;  %v1946_v34 = vmax.f32 %v1490_v18, 0.0  ;;  %v2010_v35 = vmax.f32 %v1746_v19, 0.0 }
 0x146   : > { %v2070_v14 = vadd.f32 %v2069_v5, %v1942_v3  ;;  %v2154_v15 = vadd.f32 %v2153_v6, %v2006_v4  ;;  %v1944_v24 = vmax.f32 %v1482_v7, 0.0  ;;  %v2008_v25 = vmax.f32 %v1738_v8, 0.0 }
 0x147   : > { %v1484_v16 = vpop.f32.mrf.mxu0  ;;  %v1740_v17 = vpop.f32.mrf.mxu1  ;;  %v1493_v28 = vadd.f32 %v2629_v9, %v3249_v13  ;;  %v1749_v29 = vadd.f32 %v2693_v10, %v3249_v13 }
 0x148   : > { %v1485_v20 = vadd.f32 %v3249_v13, %v1484_v16  ;;  %v1741_v21 = vadd.f32 %v3249_v13, %v1740_v17  ;;  %v3289_v22 = vadd.f32 %v2070_v14, %v1943_v11  ;;  %v3291_v23 = vadd.f32 %v2154_v15, %v2007_v12 }
 0x149   : > { %v2632_v26 = vpop.f32.mrf.mxu0  ;;  %v2696_v27 = vpop.f32.mrf.mxu1  ;;  %v1947_v42 = vmax.f32 %v1493_v28, 0.0  ;;  %v2011_v43 = vmax.f32 %v1749_v29, 0.0 }
 0x14a   : > { %v1945_v30 = vmax.f32 %v1485_v20, 0.0  ;;  %v2009_v31 = vmax.f32 %v1741_v21, 0.0  ;;  %v1506_v49 = vadd.f32 %v2632_v26, %v3249_v13  ;;  %v1762_v53 = vadd.f32 %v2696_v27, %v3249_v13 }
 0x14b   : > { %v1497_v32 = vpop.f32.mrf.mxu0  ;;  %v1753_v33 = vpop.f32.mrf.mxu1 }
 0x14c   : > { %v2078_v36 = vadd.f32 %v1945_v30, %v1944_v24  ;;  %v2162_v37 = vadd.f32 %v2009_v31, %v2008_v25  ;;  %v1498_v38 = vadd.f32 %v3249_v13, %v1497_v32  ;;  %v1754_v39 = vadd.f32 %v3249_v13, %v1753_v33 }
 0x14d   : > { %v2633_v40 = vpop.f32.mrf.mxu0  ;;  %v2697_v41 = vpop.f32.mrf.mxu1  ;;  %v1950_v2 = vmax.f32 %v1506_v49, 0.0  ;;  %v2014_v4 = vmax.f32 %v1762_v53, 0.0 }
 0x14e   : > { %v2079_v44 = vadd.f32 %v2078_v36, %v1946_v34  ;;  %v2163_v45 = vadd.f32 %v2162_v37, %v2010_v35  ;;  %v2012_v46 = vmax.f32 %v1754_v39, 0.0  ;;  %v1948_v50 = vmax.f32 %v1498_v38, 0.0 }
 0x14f   : > { %v1500_v47 = vpop.f32.mrf.mxu0  ;;  %v1756_v48 = vpop.f32.mrf.mxu1  ;;  %v1509_v60 = vadd.f32 %v2633_v40, %v3249_v13  ;;  %v1765_v61 = vadd.f32 %v2697_v41, %v3249_v13 }
 0x150   : > { %v2080_v51 = vadd.f32 %v2079_v44, %v1947_v42  ;;  %v2164_v52 = vadd.f32 %v2163_v45, %v2011_v43  ;;  %v1501_v54 = vadd.f32 %v3249_v13, %v1500_v47  ;;  %v1757_v55 = vadd.f32 %v3249_v13, %v1756_v48 }
 0x151   : > { %v2636_v56 = vpop.f32.mrf.mxu0  ;;  %v2700_v57 = vpop.f32.mrf.mxu1  ;;  %v1951_v10 = vmax.f32 %v1509_v60, 0.0  ;;  %v2015_v11 = vmax.f32 %v1765_v61, 0.0  ;;  %v2072_v45 = vrot.slane %v3289_v22, 4 }
 0x152   : > { %v2081_v58 = vadd.f32 %v2080_v51, %v1948_v50  ;;  %v2165_v59 = vadd.f32 %v2164_v52, %v2012_v46  ;;  %v1949_v62 = vmax.f32 %v1501_v54, 0.0  ;;  %v2013_v63 = vmax.f32 %v1757_v55, 0.0 }
 0x153   : > { %v1513_v0 = vpop.f32.mrf.mxu0  ;;  %v1769_v1 = vpop.f32.mrf.mxu1  ;;  %v1522_v18 = vadd.f32 %v2636_v56, %v3249_v13  ;;  %v1778_v21 = vadd.f32 %v2700_v57, %v3249_v13 }
 0x154   : > { %v1770_v3 = vadd.f32 %v3249_v13, %v1769_v1  ;;  %v2082_v5 = vadd.f32 %v2081_v58, %v1949_v62  ;;  %v2166_v6 = vadd.f32 %v2165_v59, %v2013_v63  ;;  %v1514_v7 = vadd.f32 %v3249_v13, %v1513_v0 }
 0x155   : > { %v2637_v8 = vpop.f32.mrf.mxu0  ;;  %v2701_v9 = vpop.f32.mrf.mxu1  ;;  %v1954_v37 = vmax.f32 %v1522_v18, 0.0  ;;  %v2018_v39 = vmax.f32 %v1778_v21, 0.0  ;;  %v2073_v62 = vadd.f32 %v2072_v45, %v3289_v22 }
 0x156   : > { %v2083_v12 = vadd.f32 %v2082_v5, %v1950_v2  ;;  %v2167_v14 = vadd.f32 %v2166_v6, %v2014_v4  ;;  %v2016_v15 = vmax.f32 %v1770_v3, 0.0  ;;  %v1952_v24 = vmax.f32 %v1514_v7, 0.0 }
 0x157   : > { %v1516_v16 = vpop.f32.mrf.mxu0  ;;  %v1772_v17 = vpop.f32.mrf.mxu1  ;;  %v1525_v29 = vadd.f32 %v2637_v8, %v3249_v13  ;;  %v1781_v34 = vadd.f32 %v2701_v9, %v3249_v13 }
 0x158   : > { %v1517_v19 = vadd.f32 %v3249_v13, %v1516_v16  ;;  %v1773_v20 = vadd.f32 %v3249_v13, %v1772_v17  ;;  %v2084_v25 = vadd.f32 %v2083_v12, %v1951_v10  ;;  %v2168_v26 = vadd.f32 %v2167_v14, %v2015_v11 }
 0x159   : > { %v2640_v27 = vpop.f32.mrf.mxu0  ;;  %v2704_v28 = vpop.f32.mrf.mxu1  ;;  %v1955_v46 = vmax.f32 %v1525_v29, 0.0  ;;  %v2019_v47 = vmax.f32 %v1781_v34, 0.0 }
 0x15a   : > { %v1953_v30 = vmax.f32 %v1517_v19, 0.0  ;;  %v2017_v31 = vmax.f32 %v1773_v20, 0.0  ;;  %v2085_v32 = vadd.f32 %v2084_v25, %v1952_v24  ;;  %v2169_v33 = vadd.f32 %v2168_v26, %v2016_v15 }
 0x15b   : > { %v1529_v35 = vpop.f32.mrf.mxu0  ;;  %v1785_v36 = vpop.f32.mrf.mxu1  ;;  %v1538_v53 = vadd.f32 %v2640_v27, %v3249_v13  ;;  %v1794_v54 = vadd.f32 %v2704_v28, %v3249_v13  ;;  %v2074_v15 = vrot.slane %v2073_v62, 2 }
 0x15c   : > { %v1786_v38 = vadd.f32 %v3249_v13, %v1785_v36  ;;  %v2086_v40 = vadd.f32 %v2085_v32, %v1953_v30  ;;  %v2170_v41 = vadd.f32 %v2169_v33, %v2017_v31  ;;  %v1530_v42 = vadd.f32 %v3249_v13, %v1529_v35 }
 0x15d   : > { %v2641_v43 = vpop.f32.mrf.mxu0  ;;  %v2705_v44 = vpop.f32.mrf.mxu1  ;;  %v1958_v7 = vmax.f32 %v1538_v53, 0.0  ;;  %v2022_v8 = vmax.f32 %v1794_v54, 0.0 }
 0x15e   : > { %v2087_v48 = vadd.f32 %v2086_v40, %v1954_v37  ;;  %v2171_v49 = vadd.f32 %v2170_v41, %v2018_v39  ;;  %v2020_v50 = vmax.f32 %v1786_v38, 0.0  ;;  %v1956_v57 = vmax.f32 %v1530_v42, 0.0 }
 0x15f   : > { %v1532_v51 = vpop.f32.mrf.mxu0  ;;  %v1788_v52 = vpop.f32.mrf.mxu1  ;;  %v1541_v3 = vadd.f32 %v2641_v43, %v3249_v13  ;;  %v1797_v4 = vadd.f32 %v2705_v44, %v3249_v13  ;;  %v2075_v38 = vadd.f32 %v2074_v15, %v2073_v62 }
 0x160   : > { %v1533_v55 = vadd.f32 %v3249_v13, %v1532_v51  ;;  %v1789_v56 = vadd.f32 %v3249_v13, %v1788_v52  ;;  %v2088_v58 = vadd.f32 %v2087_v48, %v1955_v46  ;;  %v2172_v59 = vadd.f32 %v2171_v49, %v2019_v47 }
 0x161   : > { %v2644_v60 = vpop.f32.mrf.mxu0  ;;  %v2708_v61 = vpop.f32.mrf.mxu1  ;;  %v1959_v16 = vmax.f32 %v1541_v3, 0.0  ;;  %v2023_v17 = vmax.f32 %v1797_v4, 0.0 }
 0x162   : > { %v1957_v63 = vmax.f32 %v1533_v55, 0.0  ;;  %v2021_v0 = vmax.f32 %v1789_v56, 0.0  ;;  %v2089_v1 = vadd.f32 %v2088_v58, %v1956_v57  ;;  %v2173_v2 = vadd.f32 %v2172_v59, %v2020_v50 }
 0x163   : > { %v1545_v5 = vpop.f32.mrf.mxu0  ;;  %v1801_v6 = vpop.f32.mrf.mxu1  ;;  %v1554_v24 = vadd.f32 %v2644_v60, %v3249_v13  ;;  %v1810_v25 = vadd.f32 %v2708_v61, %v3249_v13  ;;  %v2076_v59 = vrot.slane %v2075_v38, 1 }
 0x164   : > { %v2090_v9 = vadd.f32 %v2089_v1, %v1957_v63  ;;  %v2174_v10 = vadd.f32 %v2173_v2, %v2021_v0  ;;  %v1546_v11 = vadd.f32 %v3249_v13, %v1545_v5  ;;  %v1802_v12 = vadd.f32 %v3249_v13, %v1801_v6 }
 0x165   : > { %v2645_v14 = vpop.f32.mrf.mxu0  ;;  %v2709_v22 = vpop.f32.mrf.mxu1  ;;  %v1962_v42 = vmax.f32 %v1554_v24, 0.0  ;;  %v2026_v43 = vmax.f32 %v1810_v25, 0.0 }
 0x166   : > { %v2091_v18 = vadd.f32 %v2090_v9, %v1958_v7  ;;  %v2175_v19 = vadd.f32 %v2174_v10, %v2022_v8  ;;  %v1960_v30 = vmax.f32 %v1546_v11, 0.0  ;;  %v2024_v31 = vmax.f32 %v1802_v12, 0.0 }
 0x167   : > { %v1548_v20 = vpop.f32.mrf.mxu0  ;;  %v1804_v21 = vpop.f32.mrf.mxu1  ;;  %v1557_v34 = vadd.f32 %v2645_v14, %v3249_v13  ;;  %v1813_v35 = vadd.f32 %v2709_v22, %v3249_v13  ;;  %v2077_v14 = vadd.f32 %v2076_v59, %v2075_v38 }
 0x168   : > { %v1549_v26 = vadd.f32 %v3249_v13, %v1548_v20  ;;  %v1805_v27 = vadd.f32 %v3249_v13, %v1804_v21  ;;  %v2092_v28 = vadd.f32 %v2091_v18, %v1959_v16  ;;  %v3327_v29 = vadd.f32 %v2175_v19, %v2023_v17 }
 0x169   : > { %v2648_v32 = vpop.f32.mrf.mxu0  ;;  %v2712_v33 = vpop.f32.mrf.mxu1  ;;  %v1963_v51 = vmax.f32 %v1557_v34, 0.0  ;;  %v2027_v52 = vmax.f32 %v1813_v35, 0.0 }
 0x16a   : > { %v1961_v36 = vmax.f32 %v1549_v26, 0.0  ;;  %v2025_v37 = vmax.f32 %v1805_v27, 0.0  ;;  %v2093_v39 = vrot.slane %v2092_v28, 4  ;;  %v1570_v0 = vadd.f32 %v2648_v32, %v3249_v13 }
 0x16b   : > { %v1561_v40 = vpop.f32.mrf.mxu0  ;;  %v1817_v41 = vpop.f32.mrf.mxu1  ;;  %v1826_v16 = vadd.f32 %v2712_v33, %v3249_v13 }
 0x16c   : > { %v2099_v44 = vadd.f32 %v1961_v36, %v1960_v30  ;;  %v2183_v45 = vadd.f32 %v2025_v37, %v2024_v31  ;;  %v2094_v46 = vadd.f32 %v2093_v39, %v2092_v28  ;;  %v1562_v47 = vadd.f32 %v3249_v13, %v1561_v40 }
 0x16d   : > { %v1818_v48 = vadd.f32 %v3249_v13, %v1817_v41  ;;  %v2649_v49 = vpop.f32.mrf.mxu0  ;;  %v2713_v50 = vpop.f32.mrf.mxu1  ;;  %v1966_v15 = vmax.f32 %v1570_v0, 0.0  ;;  %v2030_v30 = vmax.f32 %v1826_v16, 0.0 }
 0x16e   : > { %v2100_v53 = vadd.f32 %v2099_v44, %v1962_v42  ;;  %v2184_v54 = vadd.f32 %v2183_v45, %v2026_v43  ;;  %v2095_v55 = vrot.slane %v2094_v46, 2  ;;  %v1964_v60 = vmax.f32 %v1562_v47, 0.0 }
 0x16f   : > { %v2028_v56 = vmax.f32 %v1818_v48, 0.0  ;;  %v1564_v57 = vpop.f32.mrf.mxu0  ;;  %v1820_v58 = vpop.f32.mrf.mxu1  ;;  %v1573_v6 = vadd.f32 %v2649_v49, %v3249_v13  ;;  %v1829_v31 = vadd.f32 %v2713_v50, %v3249_v13 }
 0x170   : > { %v2101_v61 = vadd.f32 %v2100_v53, %v1963_v51  ;;  %v2185_v62 = vadd.f32 %v2184_v54, %v2027_v52  ;;  %v2096_v63 = vadd.f32 %v2095_v55, %v2094_v46  ;;  %v1565_v1 = vadd.f32 %v3249_v13, %v1564_v57 }
 0x171   : > { %v1821_v2 = vadd.f32 %v3249_v13, %v1820_v58  ;;  %v2652_v3 = vpop.f32.mrf.mxu0  ;;  %v2716_v4 = vpop.f32.mrf.mxu1  ;;  %v1967_v20 = vmax.f32 %v1573_v6, 0.0  ;;  %v2031_v41 = vmax.f32 %v1829_v31, 0.0 }
 0x172   : > { %v2102_v5 = vadd.f32 %v2101_v61, %v1964_v60  ;;  %v2097_v7 = vrot.slane %v2096_v63, 1  ;;  %v2186_v8 = vadd.f32 %v2185_v62, %v2028_v56  ;;  %v1965_v9 = vmax.f32 %v1565_v1, 0.0 }
 0x173   : > { %v2029_v10 = vmax.f32 %v1821_v2, 0.0  ;;  %v1577_v11 = vpop.f32.mrf.mxu0  ;;  %v1833_v12 = vpop.f32.mrf.mxu1  ;;  %v1586_v46 = vadd.f32 %v2652_v3, %v3249_v13  ;;  %v1842_v55 = vadd.f32 %v2716_v4, %v3249_v13 }
 0x174   : > { %v2098_v22 = vadd.f32 %v2097_v7, %v2096_v63  ;;  %v2103_v17 = vadd.f32 %v2102_v5, %v1965_v9  ;;  %v1578_v26 = vadd.f32 %v3249_v13, %v1577_v11  ;;  %v1834_v38 = vadd.f32 %v3249_v13, %v1833_v12 }
 0x175   : > { %v2653_v18 = vpop.f32.mrf.mxu0  ;;  %v2717_v19 = vpop.f32.mrf.mxu1  ;;  %v2187_v25 = vadd.f32 %v2186_v8, %v2029_v10  ;;  %v1970_v58 = vmax.f32 %v1586_v46, 0.0  ;;  %v2034_v5 = vmax.f32 %v1842_v55, 0.0 }
 0x176   : > { %v3338_v21 = vsel %vm2233_vm0, %v2098_v22, %v2077_v14  ;;  %v2104_v24 = vadd.f32 %v2103_v17, %v1966_v15  ;;  %v1968_v37 = vmax.f32 %v1578_v26, 0.0  ;;  %v2032_v47 = vmax.f32 %v1834_v38, 0.0 }
 0x177   : > { %v1580_v27 = vpop.f32.mrf.mxu0  ;;  %v1836_v28 = vpop.f32.mrf.mxu1  ;;  %v2188_v36 = vadd.f32 %v2187_v25, %v2030_v30  ;;  %v1589_v56 = vadd.f32 %v2653_v18, %v3249_v13  ;;  %v1845_v57 = vadd.f32 %v2717_v19, %v3249_v13 }
 0x178   : > { %v2105_v32 = vadd.f32 %v2104_v24, %v1967_v20  ;;  %v1581_v34 = vadd.f32 %v3249_v13, %v1580_v27  ;;  %v1837_v49 = vadd.f32 %v3249_v13, %v1836_v28 }
 0x179   : > { %v2656_v35 = vpop.f32.mrf.mxu0  ;;  %v2720_v33 = vpop.f32.mrf.mxu1  ;;  %v2189_v48 = vadd.f32 %v2188_v36, %v2031_v41  ;;  %v1971_v6 = vmax.f32 %v1589_v56, 0.0  ;;  %v2035_v7 = vmax.f32 %v1845_v57, 0.0 }
 0x17a   : > { %v2106_v42 = vadd.f32 %v2105_v32, %v1968_v37  ;;  %v1969_v43 = vmax.f32 %v1581_v34, 0.0  ;;  %v2033_v60 = vmax.f32 %v1837_v49, 0.0  ;;  %v3356_v8 = vadd.f32 %v2656_v35, %v3249_v13 }
 0x17b   : > { %v1593_v39 = vpop.f32.mrf.mxu0  ;;  %v1849_v40 = vpop.f32.mrf.mxu1  ;;  %v2190_v59 = vadd.f32 %v2189_v48, %v2032_v47  ;;  %v3359_v9 = vadd.f32 %v2720_v33, %v3249_v13 }
 0x17c   : > { %v2107_v52 = vadd.f32 %v2106_v42, %v1969_v43  ;;  %v1594_v10 = vadd.f32 %v3249_v13, %v1593_v39  ;;  %v1974_v32 = vmax.f32 %v3356_v8, 0.0  ;;  %v1850_v35 = vadd.f32 %v3249_v13, %v1849_v40 }
 0x17d   : > { %v3344_v44 = vpop.f32.mrf.mxu0  ;;  %v3346_v45 = vpop.f32.mrf.mxu1  ;;  %v2191_v4 = vadd.f32 %v2190_v59, %v2033_v60 }
 0x17e   : > { %v2108_v63 = vadd.f32 %v2107_v52, %v1970_v58  ;;  %v1972_v34 = vmax.f32 %v1594_v10, 0.0  ;;  %v2036_v55 = vmax.f32 %v1850_v35, 0.0  ;;  %v2038_v10 = vmax.f32 %v3359_v9, 0.0 }
 0x17f   : > { %v1596_v50 = vpop.f32.mrf.mxu0  ;;  %v1852_v51 = vpop.f32.mrf.mxu1  ;;  %v2192_v31 = vadd.f32 %v2191_v4, %v2034_v5  ;;  %v1861_v9 = vadd.f32 %v3346_v45, %v3249_v13 }
 0x180   : > { %v2109_v17 = vadd.f32 %v2108_v63, %v1971_v6  ;;  %v1597_v18 = vadd.f32 %v3249_v13, %v1596_v50  ;;  %v1853_v56 = vadd.f32 %v3249_v13, %v1852_v51 }
 0x181   : > { %v2660_v53 = vpop.f32.mrf.mxu0  ;;  %v2724_v54 = vpop.f32.mrf.mxu1  ;;  %v2193_v40 = vadd.f32 %v2192_v31, %v2035_v7 }
 0x182   : > { %v1618_v14 = vadd.f32 %v2660_v53, %v3249_v13  ;;  %v1874_v22 = vadd.f32 %v2724_v54, %v3249_v13  ;;  %v2110_v42 = vadd.f32 %v2109_v17, %v1972_v34  ;;  %v1973_v43 = vmax.f32 %v1597_v18, 0.0 }
 0x183   : > { %v1609_v61 = vpop.f32.mrf.mxu0  ;;  %v1865_v62 = vpop.f32.mrf.mxu1 }
 0x184   : > { %v1610_v0 = vadd.f32 %v3249_v13, %v1609_v61  ;;  %v1866_v1 = vadd.f32 %v3249_v13, %v1865_v62  ;;  %v1978_v37 = vmax.f32 %v1618_v14, 0.0  ;;  %v2042_v38 = vmax.f32 %v1874_v22, 0.0 }
 0x185   : > { %v2661_v2 = vpop.f32.mrf.mxu0  ;;  %v2725_v3 = vpop.f32.mrf.mxu1  ;;  %v2111_v51 = vadd.f32 %v2110_v42, %v1973_v43 }
 0x186   : > { %v1976_v19 = vmax.f32 %v1610_v0, 0.0  ;;  %v2040_v20 = vmax.f32 %v1866_v1, 0.0  ;;  %v1621_v26 = vadd.f32 %v2661_v2, %v3249_v13  ;;  %v1877_v27 = vadd.f32 %v2725_v3, %v3249_v13 }
 0x187   : > { %v1612_v11 = vpop.f32.mrf.mxu0  ;;  %v1868_v12 = vpop.f32.mrf.mxu1  ;;  %v1605_v0 = vadd.f32 %v3344_v44, %v3249_v13 }
 0x188   : > { %v1613_v15 = vadd.f32 %v3249_v13, %v1612_v11  ;;  %v1869_v16 = vadd.f32 %v3249_v13, %v1868_v12  ;;  %v1979_v50 = vmax.f32 %v1621_v26, 0.0  ;;  %v2043_v52 = vmax.f32 %v1877_v27, 0.0 }
 0x189   : > { %v2664_v24 = vpop.f32.mrf.mxu0  ;;  %v2728_v25 = vpop.f32.mrf.mxu1 }
 0x18a   : > { %v1977_v28 = vmax.f32 %v1613_v15, 0.0  ;;  %v2041_v30 = vmax.f32 %v1869_v16, 0.0  ;;  %v1634_v60 = vadd.f32 %v2664_v24, %v3249_v13  ;;  %v1890_v1 = vadd.f32 %v2728_v25, %v3249_v13 }
 0x18b   : > { %v1625_v33 = vpop.f32.mrf.mxu0  ;;  %v1881_v36 = vpop.f32.mrf.mxu1  ;;  %v2194_v15 = vadd.f32 %v2193_v40, %v2036_v55  ;;  %v2037_v16 = vmax.f32 %v1853_v56, 0.0 }
 0x18c   : > { %v2120_v39 = vadd.f32 %v1977_v28, %v1976_v19  ;;  %v2204_v41 = vadd.f32 %v2041_v30, %v2040_v20  ;;  %v1626_v46 = vadd.f32 %v3249_v13, %v1625_v33  ;;  %v1882_v47 = vadd.f32 %v3249_v13, %v1881_v36 }
 0x18d   : > { %v2665_v48 = vpop.f32.mrf.mxu0  ;;  %v2729_v49 = vpop.f32.mrf.mxu1  ;;  %v1982_v17 = vmax.f32 %v1634_v60, 0.0  ;;  %v2046_v19 = vmax.f32 %v1890_v1, 0.0  ;;  %v1975_v28 = vmax.f32 %v1605_v0, 0.0  ;;  %v2112_v30 = vadd.f32 %v2111_v51, %v1974_v32 }
 0x18e   : > { %v2121_v53 = vadd.f32 %v2120_v39, %v1978_v37  ;;  %v2205_v54 = vadd.f32 %v2204_v41, %v2042_v38  ;;  %v2044_v57 = vmax.f32 %v1882_v47, 0.0  ;;  %v1980_v61 = vmax.f32 %v1626_v46, 0.0 }
 0x18f   : > { %v1628_v58 = vpop.f32.mrf.mxu0  ;;  %v1884_v59 = vpop.f32.mrf.mxu1  ;;  %v1637_v8 = vadd.f32 %v2665_v48, %v3249_v13  ;;  %v1893_v11 = vadd.f32 %v2729_v49, %v3249_v13  ;;  %v2195_v39 = vadd.f32 %v2194_v15, %v2037_v16 }
 0x190   : > { %v2122_v62 = vadd.f32 %v2121_v53, %v1979_v50  ;;  %v2206_v63 = vadd.f32 %v2205_v54, %v2043_v52  ;;  %v1629_v2 = vadd.f32 %v3249_v13, %v1628_v58  ;;  %v1885_v3 = vadd.f32 %v3249_v13, %v1884_v59 }
 0x191   : > { %v2668_v5 = vpop.f32.mrf.mxu0  ;;  %v2732_v6 = vpop.f32.mrf.mxu1  ;;  %v1983_v31 = vmax.f32 %v1637_v8, 0.0  ;;  %v2047_v34 = vmax.f32 %v1893_v11, 0.0  ;;  %v2113_v50 = vadd.f32 %v2112_v30, %v1975_v28  ;;  %v2196_v59 = vadd.f32 %v2195_v39, %v2038_v10 }
 0x192   : > { %v2123_v7 = vadd.f32 %v2122_v62, %v1980_v61  ;;  %v2207_v4 = vadd.f32 %v2206_v63, %v2044_v57  ;;  %v1981_v12 = vmax.f32 %v1629_v2, 0.0  ;;  %v2045_v14 = vmax.f32 %v1885_v3, 0.0 }
 0x193   : > { %v1641_v44 = vpop.f32.mrf.mxu0  ;;  %v1897_v22 = vpop.f32.mrf.mxu1  ;;  %v1650_v41 = vadd.f32 %v2668_v5, %v3249_v13  ;;  %v1906_v46 = vadd.f32 %v2732_v6, %v3249_v13  ;;  %v2156_v5 = vrot.slane %v3291_v23, 4  ;;  %v2039_v6 = vmax.f32 %v1861_v9, 0.0 }
 0x194   : > { %v1898_v18 = vadd.f32 %v3249_v13, %v1897_v22  ;;  %v2124_v20 = vadd.f32 %v2123_v7, %v1981_v12  ;;  %v2208_v24 = vadd.f32 %v2207_v4, %v2045_v14  ;;  %v1642_v25 = vadd.f32 %v3249_v13, %v1641_v44 }
 0x195   : > { %v2669_v26 = vpop.f32.mrf.mxu0  ;;  %v2733_v27 = vpop.f32.mrf.mxu1  ;;  %v1986_v60 = vmax.f32 %v1650_v41, 0.0  ;;  %v2050_v62 = vmax.f32 %v1906_v46, 0.0  ;;  %v2114_v51 = vrot.slane %v2113_v50, 4  ;;  %v2197_v44 = vadd.f32 %v2196_v59, %v2039_v6 }
 0x196   : > { %v2125_v35 = vadd.f32 %v2124_v20, %v1982_v17  ;;  %v2209_v33 = vadd.f32 %v2208_v24, %v2046_v19  ;;  %v2048_v36 = vmax.f32 %v1898_v18, 0.0  ;;  %v1984_v47 = vmax.f32 %v1642_v25, 0.0 }
 0x197   : > { %v1644_v37 = vpop.f32.mrf.mxu0  ;;  %v1900_v38 = vpop.f32.mrf.mxu1  ;;  %v1653_v52 = vadd.f32 %v2669_v26, %v3249_v13  ;;  %v1909_v56 = vadd.f32 %v2733_v27, %v3249_v13  ;;  %v2177_v24 = vrot.slane %v3327_v29, 4  ;;  %v2115_v25 = vadd.f32 %v2114_v51, %v2113_v50 }
 0x198   : > { %v1645_v42 = vadd.f32 %v3249_v13, %v1644_v37  ;;  %v1901_v43 = vadd.f32 %v3249_v13, %v1900_v38  ;;  %v2126_v48 = vadd.f32 %v2125_v35, %v1983_v31  ;;  %v2210_v45 = vadd.f32 %v2209_v33, %v2047_v34 }
 0x199   : > { %v2672_v32 = vpop.f32.mrf.mxu0  ;;  %v2736_v49 = vpop.f32.mrf.mxu1  ;;  %v1987_v7 = vmax.f32 %v1653_v52, 0.0  ;;  %v2051_v4 = vmax.f32 %v1909_v56, 0.0  ;;  %v2198_v34 = vrot.slane %v2197_v44, 4  ;;  %v2157_v38 = vadd.f32 %v2156_v5, %v3291_v23 }
 0x19a   : > { %v1985_v53 = vmax.f32 %v1645_v42, 0.0  ;;  %v2049_v54 = vmax.f32 %v1901_v43, 0.0  ;;  %v2127_v55 = vadd.f32 %v2126_v48, %v1984_v47  ;;  %v2211_v40 = vadd.f32 %v2210_v45, %v2048_v36 }
 0x19b   : > { %v1657_v57 = vpop.f32.mrf.mxu0  ;;  %v1913_v58 = vpop.f32.mrf.mxu1  ;;  %v1666_v22 = vadd.f32 %v2672_v32, %v3249_v13  ;;  %v1922_v17 = vadd.f32 %v2736_v49, %v3249_v13  ;;  %v2178_v39 = vadd.f32 %v2177_v24, %v3327_v29  ;;  %v2116_v41 = vrot.slane %v2115_v25, 2 }
 0x19c   : > { %v1914_v61 = vadd.f32 %v3249_v13, %v1913_v58  ;;  %v2128_v63 = vadd.f32 %v2127_v55, %v1985_v53  ;;  %v2212_v0 = vadd.f32 %v2211_v40, %v2049_v54  ;;  %v1658_v1 = vadd.f32 %v3249_v13, %v1657_v57 }
 0x19d   : > { %v2673_v2 = vpop.f32.mrf.mxu0  ;;  %v2737_v3 = vpop.f32.mrf.mxu1  ;;  %v1990_v35 = vmax.f32 %v1666_v22, 0.0  ;;  %v2054_v33 = vmax.f32 %v1922_v17, 0.0  ;;  %v2199_v48 = vadd.f32 %v2198_v34, %v2197_v44  ;;  %v2158_v49 = vrot.slane %v2157_v38, 2 }
 0x19e   : > { %v2129_v8 = vadd.f32 %v2128_v63, %v1986_v60  ;;  %v2213_v11 = vadd.f32 %v2212_v0, %v2050_v62  ;;  %v2052_v12 = vmax.f32 %v1914_v61, 0.0  ;;  %v1988_v18 = vmax.f32 %v1658_v1, 0.0 }
 0x19f   : > { %v1660_v10 = vpop.f32.mrf.mxu0  ;;  %v1916_v14 = vpop.f32.mrf.mxu1  ;;  %v1669_v30 = vadd.f32 %v2673_v2, %v3249_v13  ;;  %v1925_v31 = vadd.f32 %v2737_v3, %v3249_v13  ;;  %v2117_v50 = vadd.f32 %v2116_v41, %v2115_v25  ;;  %v2200_v54 = vrot.slane %v2199_v48, 2 }
 0x1a0   : > { %v1661_v15 = vadd.f32 %v3249_v13, %v1660_v10  ;;  %v1917_v16 = vadd.f32 %v3249_v13, %v1916_v14  ;;  %v2130_v19 = vadd.f32 %v2129_v8, %v1987_v7  ;;  %v2214_v20 = vadd.f32 %v2213_v11, %v2051_v4 }
 0x1a1   : > { %v1991_v42 = vmax.f32 %v1669_v30, 0.0  ;;  %v2055_v43 = vmax.f32 %v1925_v31, 0.0  ;;  %v2179_v13 = vrot.slane %v2178_v39, 2  ;;  %v2159_v56 = vadd.f32 %v2158_v49, %v2157_v38 }
 0x1a2   : > { %v1989_v26 = vmax.f32 %v1661_v15, 0.0  ;;  %v2053_v27 = vmax.f32 %v1917_v16, 0.0  ;;  %v2131_v28 = vadd.f32 %v2130_v19, %v1988_v18  ;;  %v2215_v9 = vadd.f32 %v2214_v20, %v2052_v12  ;;  %v2056_v12 = vld [vmem:[#allocation2] sm:$0xff] }
 0x1a3   : > { %v2118_v23 = vrot.slane %v2117_v50, 1  ;;  %v2180_v57 = vadd.f32 %v2179_v13, %v2178_v39  ;;  %v2201_v59 = vadd.f32 %v2200_v54, %v2199_v48  ;;  %v2160_v62 = vrot.slane %v2159_v56, 1 }
 0x1a4   : > { %v2132_v36 = vadd.f32 %v2131_v28, %v1989_v26  ;;  %v2216_v37 = vadd.f32 %v2215_v9, %v2053_v27 }
 0x1a5   : > { %v2119_v63 = vadd.f32 %v2118_v23, %v2117_v50  ;;  %v2181_v0 = vrot.slane %v2180_v57, 1  ;;  %v2202_v2 = vrot.slane %v2201_v59, 1  ;;  %v2161_v6 = vadd.f32 %v2160_v62, %v2159_v56 }
 0x1a6   : > { %v2133_v46 = vadd.f32 %v2132_v36, %v1990_v35  ;;  %v2217_v47 = vadd.f32 %v2216_v37, %v2054_v33 }
 0x1a7   : > { %v2236_v51 = vsel %vm2235_vm1, %v2119_v63, %v3338_v21  ;;  %v2182_v7 = vadd.f32 %v2181_v0, %v2180_v57  ;;  %v2203_v8 = vadd.f32 %v2202_v2, %v2201_v59 }
 0x1a8   : > { %v2134_v45 = vadd.f32 %v2133_v46, %v1991_v42  ;;  %v2218_v32 = vadd.f32 %v2217_v47, %v2055_v43 }
 0x1aa   : > { %v2135_v52 = vrot.slane %v2134_v45, 4  ;;  %v2219_v53 = vrot.slane %v2218_v32, 4 }
 0x1ac   : > { %v2136_v55 = vadd.f32 %v2135_v52, %v2134_v45  ;;  %v2220_v40 = vadd.f32 %v2219_v53, %v2218_v32 }
 0x1ae   : > { %v2137_v29 = vrot.slane %v2136_v55, 2  ;;  %v2221_v58 = vrot.slane %v2220_v40, 2 }
 0x1b0   : > { %v2138_v60 = vadd.f32 %v2137_v29, %v2136_v55  ;;  %v2222_v61 = vadd.f32 %v2221_v58, %v2220_v40 }
 0x1b2   : > { %v2139_v1 = vrot.slane %v2138_v60, 1  ;;  %v2223_v5 = vrot.slane %v2222_v61, 1 }
 0x1b4   : > { %v2140_v3 = vadd.f32 %v2139_v1, %v2138_v60  ;;  %v2224_v10 = vadd.f32 %v2223_v5, %v2222_v61 }
 0x1b6   : > { %v2238_v4 = vsel %vm2237_vm2, %v2140_v3, %v2236_v51 }
 0x1b7   : > { %v2240_v11 = vsel %vm2239_vm3, %v2161_v6, %v2238_v4 }
 0x1b8   : > { %v2242_v14 = vsel %vm2241_vm4, %v2182_v7, %v2240_v11 }
 0x1b9   : > { %v2244_v44 = vsel %vm2243_vm5, %v2203_v8, %v2242_v14  ;;  %2253 = sbr.rel (%p2499_p10) target bundleno = 675 (0x2a3), region = 89 }
 0x1ba   : > { %v2246_v22 = vsel %vm2245_vm6, %v2224_v10, %v2244_v44 }
 0x1bb   : > { %v2248_v15 = vadd.f32 %v2246_v22, %v2056_v12 }
 0x1bd   : > { %2249 = vst [vmem:[#allocation2] sm:$0xff] %v2248_v15 }
 0x1be   : > { %v2270_v21 = vld [vmem:[%s3479_s3 + $0x78] sm:$0xff]  ;;  %v2945_v16 = vmov 0.0   ;;  %v2269_v17 = vld [vmem:[%s3479_s3 + $0x70] sm:$0xff]  ;;  %vm2946_vm7 = vmmov 0   ;;  %v2268_v18 = vld [vmem:[%s3479_s3 + $0x68] sm:$0xff] }
 0x1bf   : > { %2738 = vmatprep.subr.mxu0 %v2945_v16  ;;  %2770 = vmatprep.mubr.msk.f32.mxu0 %vm2946_vm7, %v2945_v16  ;;  %v2267_v19 = vld [vmem:[%s3479_s3 + $0x60] sm:$0xff]  ;;  %v2266_v20 = vld [vmem:[%s3479_s3 + $0x58] sm:$0xff]  ;;  %v2265_v24 = vld [vmem:[%s3479_s3 + $0x50] sm:$0xff] }
 0x1c0   : > { %2739 = vmatpush3.msra.mxu0 %v2270_v21  ;;  %v2264_v25 = vld [vmem:[%s3479_s3 + $0x48] sm:$0xff]  ;;  %v2263_v26 = vld [vmem:[%s3479_s3 + $0x40] sm:$0xff]  ;;  %v2262_v27 = vld [vmem:[%s3479_s3 + $0x38] sm:$0xff] }
 0x1c1   : > { %2740 = vmatprep.subr.mxu0 %v2945_v16  ;;  %v2261_v28 = vld [vmem:[%s3479_s3 + $0x30] sm:$0xff]  ;;  %v2260_v9 = vld [vmem:[%s3479_s3 + $0x28] sm:$0xff]  ;;  %v2259_v30 = vld [vmem:[%s3479_s3 + $0x20] sm:$0xff] }
 0x1c2   : > { %2741 = vmatpush3.msra.mxu0 %v2269_v17  ;;  %v2258_v31 = vld [vmem:[%s3479_s3 + $0x18] sm:$0xff]  ;;  %v2257_v34 = vld [vmem:[%s3479_s3 + $0x10] sm:$0xff]  ;;  %v2256_v35 = vld [vmem:[%s3479_s3 + $0x8] sm:$0xff] }
 0x1c3   : > { %2742 = vmatprep.subr.mxu0 %v2945_v16  ;;  %v2255_v33 = vld [vmem:[%s3479_s3] sm:$0xff] }
 0x1c4   : > { %2743 = vmatpush3.msra.mxu0 %v2268_v18  ;;  %v2254_v36 = vld [vmem:[#allocation2] sm:$0xff] }
 0x1c5   : > { %2744 = vmatprep.subr.mxu0 %v2945_v16  ;;  %v2500_v37 = vld [vmem:[%s3480_s4] ss:$0 sm:$0xff] }
 0x1c6   : > { %2745 = vmatpush3.msra.mxu0 %v2267_v19 }
 0x1c7   : > { %2746 = vmatprep.subr.mxu0 %v2945_v16 }
 0x1c8   : > { %2747 = vmatpush3.msra.mxu0 %v2266_v20 }
 0x1c9   : > { %2748 = vmatprep.subr.mxu0 %v2945_v16 }
 0x1ca   : > { %2749 = vmatpush3.msra.mxu0 %v2265_v24 }
 0x1cb   : > { %2750 = vmatprep.subr.mxu0 %v2945_v16 }
 0x1cc   : > { %2751 = vmatpush3.msra.mxu0 %v2264_v25 }
 0x1cd   : > { %2752 = vmatprep.subr.mxu0 %v2945_v16 }
 0x1ce   : > { %2753 = vmatpush3.msra.mxu0 %v2263_v26 }
 0x1cf   : > { %2754 = vmatprep.subr.mxu0 %v2945_v16 }
 0x1d0   : > { %2755 = vmatpush3.msra.mxu0 %v2262_v27 }
 0x1d1   : > { %2756 = vmatprep.subr.mxu0 %v2945_v16 }
 0x1d2   : > { %2757 = vmatpush3.msra.mxu0 %v2261_v28 }
 0x1d3   : > { %2758 = vmatprep.subr.mxu0 %v2945_v16 }
 0x1d4   : > { %2759 = vmatpush3.msra.mxu0 %v2260_v9 }
 0x1d5   : > { %2760 = vmatprep.subr.mxu0 %v2945_v16 }
 0x1d6   : > { %2761 = vmatpush3.msra.mxu0 %v2259_v30 }
 0x1d7   : > { %2762 = vmatprep.subr.mxu0 %v2945_v16 }
 0x1d8   : > { %2763 = vmatpush3.msra.mxu0 %v2258_v31 }
 0x1d9   : > { %2764 = vmatprep.subr.mxu0 %v2945_v16 }
 0x1da   : > { %2765 = vmatpush3.msra.mxu0 %v2257_v34 }
 0x1db   : > { %2766 = vmatprep.subr.mxu0 %v2945_v16 }
 0x1dc   : > { %2767 = vmatpush3.msra.mxu0 %v2256_v35 }
 0x1dd   : > { %2768 = vmatprep.subr.mxu0 %v2945_v16 }
 0x1de   : > { %2769 = vmatpush3.msra.mxu0 %v2255_v33 }
 0x1df   : > { %2771 = vmatmul.mubr.f32.vlgmr.msra.gmra.mxu0 %v2254_v36 }
 0x29f   : > { %v2344_v38 = vpop.f32.mrf.mxu0 }
 0x2a0   : > { %v2345_v39 = vadd.f32 %v2500_v37, %v2344_v38 }
 0x2a1   : > { %v2772_v41 = vpop.f32.mrf.mxu0 }
 0x2a2   : > { %2348 = vst [vmem:[%s3481_s5] sm:$0xff] %v2345_v39 }
 0x2a3 PF: > { %s15_s22 = sadd.s32 1, %s2942_s22   ;;  %s3482_s18 = smov %s2930_s19 }
 0x2a4   : > { %p12_p11 = scmp.ge.s32.totalorder %s15_s22, 4   ;;  %s3483_s19 = smov %s3012_s26 }
 0x2a5   : > { %s3484_s20 = smov %s2938_s21  ;;  %s3485_s21 = smov %s3487_s23 }
 0x2a6   :  { %14 = sbr.rel (!%p12_p11) target bundleno = 3 (0x3), region = 124 }

</bundles_post_ra>
